<compile_context>
chip_gen: v6e
topology: v6e:2x2x1
jax: 0.10.0
libtpu: 0.0.40
codegen_flags: <defaults>
</compile_context>

<pallas_src>
import math

import jax
import jax.numpy as jnp
from jax.experimental import pallas as pl
from jax.experimental.pallas import tpu as pltpu

# ---- small model config (consistent with the module's __init__ arguments) ----
IMG_H = IMG_W = 16          # img_height, img_width
IN_CH = 4                   # img_in_channels
PATCH = 8                   # patch_dim
EMB = 32                    # emb_dim
LAYERS = 2                  # num_layers
HEADS = 4                   # num_attention_heads
HEAD_DIM = EMB // HEADS
FF = 64                     # pwff_hidden_dim
NUM_EXTRA = 1               # num_classification_heads (== number of class tokens)
NUM_CLASSES = 10            # mlp_outputs_list = (10,)
N_PATCH = (IMG_H // PATCH) * (IMG_W // PATCH)
SEQ = N_PATCH + NUM_EXTRA
PATCH_K = IN_CH * PATCH * PATCH
LN_EPS = 1e-5               # encoder LayerNorms (PyTorch nn.LayerNorm default)
FINAL_EPS = 1e-6            # final_layer_norm eps (explicit in the module)
HEAD_PAD = 128              # lane-dense logits: NUM_CLASSES padded to 128 lanes
W_IN_COLS = 3 * EMB + EMB + FF   # lane-packed per-layer weight slab [Wqkv | Wo | W1]


def _layer_norm(x, g, b, eps):
    mu = jnp.mean(x, axis=-1, keepdims=True)
    var = jnp.mean(jnp.square(x - mu), axis=-1, keepdims=True)
    return (x - mu) * jax.lax.rsqrt(var + eps) * g + b


def _gelu(x):
    # TODO(synk): PyTorch nn.GELU default is the exact erf form; tanh approximation used here.
    c = math.sqrt(2.0 / math.pi)
    return 0.5 * x * (1.0 + jnp.tanh(c * (x + 0.044715 * x * x * x)))


def vit_kernel(patches_ref, base_ref, mask_ref, wemb_ref,
               w_in_ref, w2_ref,
               ln_ref, bqkv_ref, bmisc_ref, bff_ref,
               lnf_ref, whead_ref,
               out_ref):
    # Patch embedding on the whole batch-folded slab [ROWS, PATCH_K] (bf16 MXU, f32 acc).
    # Class-token rows of `patches` are zero, so `base` supplies cls + pos there.
    x = jnp.dot(patches_ref[0], wemb_ref[...],
                preferred_element_type=jnp.float32) + base_ref[...]          # [ROWS, EMB]
    mask = mask_ref[...]            # block-diagonal: 0 within an image, -1e9 across images
    scale = 1.0 / math.sqrt(HEAD_DIM)

    for l in range(LAYERS):                                  # static unrolled layer loop
        w_in = w_in_ref[l]                                   # [EMB, 3E+E+FF] bf16
        wqkv = w_in[:, :3 * EMB]
        wo = w_in[:, 3 * EMB:4 * EMB]
        w1 = w_in[:, 4 * EMB:]
        ln = ln_ref[l]                                       # [4, EMB]  (ln1_g, ln1_b, ln2_g, ln2_b)
        bmisc = bmisc_ref[l]                                 # [2, EMB]  (bo, b2)

        # ---------------- multi-head self attention (pre-LN) ----------------
        h = _layer_norm(x, ln[0:1, :], ln[1:2, :], LN_EPS)
        qkv = jnp.dot(h.astype(jnp.bfloat16), wqkv,
                      preferred_element_type=jnp.float32) + bqkv_ref[l]      # [ROWS, 3*EMB]
        heads = []
        for hh in range(HEADS):                              # static per-head loop
            lo = hh * HEAD_DIM
            qh = (qkv[:, lo:lo + HEAD_DIM] * scale).astype(jnp.bfloat16)
            kh = qkv[:, EMB + lo:EMB + lo + HEAD_DIM].astype(jnp.bfloat16)
            vh = qkv[:, 2 * EMB + lo:2 * EMB + lo + HEAD_DIM].astype(jnp.bfloat16)
            s = jax.lax.dot_general(qh, kh, (((1,), (1,)), ((), ())),
                                    preferred_element_type=jnp.float32) + mask
            s = s - jnp.max(s, axis=-1, keepdims=True)
            p = jnp.exp(s)
            p = p * pl.reciprocal(jnp.sum(p, axis=-1, keepdims=True), approx=True)
            heads.append(jnp.dot(p.astype(jnp.bfloat16), vh,
                                 preferred_element_type=jnp.float32))        # [ROWS, HEAD_DIM]
        attn = jnp.concatenate(heads, axis=-1)               # [ROWS, EMB]
        attn = jnp.dot(attn.astype(jnp.bfloat16), wo,
                       preferred_element_type=jnp.float32) + bmisc[0:1, :]
        x = x + attn

        # ---------------- position-wise feed forward (pre-LN) ---------------
        h2 = _layer_norm(x, ln[2:3, :], ln[3:4, :], LN_EPS)
        f = _gelu(jnp.dot(h2.astype(jnp.bfloat16), w1,
                          preferred_element_type=jnp.float32) + bff_ref[l])
        f = jnp.dot(f.astype(jnp.bfloat16), w2_ref[l],
                    preferred_element_type=jnp.float32) + bmisc[1:2, :]
        x = x + f

    # final LayerNorm; classifier heads computed for ALL rows so the store is a full
    # lane-dense [ROWS, 128] slab (class-token rows are selected in the wrapper).
    xf = _layer_norm(x, lnf_ref[0:1, :], lnf_ref[1:2, :], FINAL_EPS).astype(jnp.bfloat16)
    for t in range(NUM_EXTRA):
        out_ref[0, t, :, :] = jnp.dot(xf, whead_ref[t],
                                      preferred_element_type=jnp.float32)


def extract_patches(x):
    """NCHW image -> [B, N_PATCH, C*P*P] with (c, ph_in, pw_in) flattening order
    (matches Conv2d weight flattening) and row-major (ph, pw) patch order
    (matches Rearrange 'b d ph pw -> b (ph pw) d')."""
    b = x.shape[0]
    hp, wp = IMG_H // PATCH, IMG_W // PATCH
    x = x.reshape(b, IN_CH, hp, PATCH, wp, PATCH)
    x = x.transpose(0, 2, 4, 1, 3, 5)            # [B, hp, wp, C, P, P]
    return x.reshape(b, hp * wp, PATCH_K)


def init_params(key):
    ks = iter(jax.random.split(key, 24))
    nrm = lambda shape: 0.02 * jax.random.normal(next(ks), shape, jnp.float32)
    p = {
        "w_emb": nrm((PATCH_K, EMB)),          # Conv2d(C, D, P, stride=P, bias=False) flattened
        "cls":   nrm((NUM_EXTRA, EMB)),        # module inits zeros; randomized for a nontrivial test
        "pos":   nrm((SEQ, EMB)),              # PositionalEmbedding1D
        "ln1_g": jnp.ones((LAYERS, 1, EMB), jnp.float32),
        "ln1_b": jnp.zeros((LAYERS, 1, EMB), jnp.float32),
        "wq": nrm((LAYERS, EMB, EMB)), "bq": nrm((LAYERS, 1, EMB)),
        "wk": nrm((LAYERS, EMB, EMB)), "bk": nrm((LAYERS, 1, EMB)),
        "wv": nrm((LAYERS, EMB, EMB)), "bv": nrm((LAYERS, 1, EMB)),
        "wo": nrm((LAYERS, EMB, EMB)), "bo": nrm((LAYERS, 1, EMB)),
        "ln2_g": jnp.ones((LAYERS, 1, EMB), jnp.float32),
        "ln2_b": jnp.zeros((LAYERS, 1, EMB), jnp.float32),
        "w1": nrm((LAYERS, EMB, FF)), "b1": nrm((LAYERS, 1, FF)),
        "w2": nrm((LAYERS, FF, EMB)), "b2": nrm((LAYERS, 1, EMB)),
        "lnf_g": jnp.ones((1, EMB), jnp.float32),
        "lnf_b": jnp.zeros((1, EMB), jnp.float32),
        "w_head": nrm((NUM_EXTRA, EMB, NUM_CLASSES)),   # Linear(emb, 10, bias=False)
    }
    return p


def _const_spec(shape):
    nd = len(shape)
    return pl.BlockSpec(shape, lambda t, nd=nd: (0,) * nd)


def vit_forward(x, params, b_tile=None):
    B = x.shape[0]
    if b_tile is None:
        # ~24 images (~120 rows) per grid step, but keep >= 2 grid steps when the
        # batch allows so both v7x TensorCores get work.
        num_tiles = max(2, -(-B // 24)) if B >= 2 else 1
        b_tile = -(-B // num_tiles)
    num_tiles = -(-B // b_tile)
    Bp = num_tiles * b_tile
    rows = b_tile * SEQ

    # ---- batch-folded patch slab [num_tiles, rows, PATCH_K] (bf16 MXU operand) ----
    patches = extract_patches(x)                                         # [B, N_PATCH, K]
    patches = jnp.pad(patches, ((0, Bp - B), (0, NUM_EXTRA), (0, 0)))    # zero cls rows + batch pad
    patches = patches.reshape(num_tiles, rows, PATCH_K).astype(jnp.bfloat16)

    # per-token additive base = pos emb (+ class-token values), tiled over the batch tile
    base_one = params["pos"].at[N_PATCH:, :].add(params["cls"])          # [SEQ, EMB]
    base = jnp.tile(base_one, (b_tile, 1))                               # [rows, EMB]

    # block-diagonal attention mask so folded images do not attend to each other
    img_id = jnp.repeat(jnp.arange(b_tile, dtype=jnp.int32), SEQ)
    mask = jnp.where(img_id[:, None] == img_id[None, :], 0.0, -1e9).astype(jnp.float32)

    # ---- packed weight slabs (few DMAs; bf16 MXU operands, f32 biases/LN params) ----
    w_emb = params["w_emb"].astype(jnp.bfloat16)
    w_in = jnp.concatenate(
        [params["wq"], params["wk"], params["wv"], params["wo"], params["w1"]],
        axis=-1).astype(jnp.bfloat16)                                    # [L, EMB, 3E+E+FF]
    w2 = params["w2"].astype(jnp.bfloat16)                               # [L, FF, EMB]
    ln_vec = jnp.concatenate([params["ln1_g"], params["ln1_b"],
                              params["ln2_g"], params["ln2_b"]], axis=1)  # [L, 4, EMB]
    bqkv = jnp.concatenate([params["bq"], params["bk"], params["bv"]], axis=-1)  # [L, 1, 3E]
    bmisc = jnp.concatenate([params["bo"], params["b2"]], axis=1)        # [L, 2, EMB]
    bff = params["b1"]                                                   # [L, 1, FF]
    lnf = jnp.concatenate([params["lnf_g"], params["lnf_b"]], axis=0)    # [2, EMB]
    w_head = jnp.pad(params["w_head"],
                     ((0, 0), (0, 0), (0, HEAD_PAD - NUM_CLASSES))).astype(jnp.bfloat16)

    in_specs = [
        pl.BlockSpec((1, rows, PATCH_K), lambda t: (t, 0, 0)),           # per-tile patches
        _const_spec((rows, EMB)),                                        # base
        _const_spec((rows, rows)),                                       # attention mask
        _const_spec((PATCH_K, EMB)),                                     # w_emb
        _const_spec((LAYERS, EMB, W_IN_COLS)),                           # [Wqkv|Wo|W1]
        _const_spec((LAYERS, FF, EMB)),                                  # W2
        _const_spec((LAYERS, 4, EMB)),                                   # LN params
        _const_spec((LAYERS, 1, 3 * EMB)),                               # qkv bias
        _const_spec((LAYERS, 2, EMB)),                                   # bo, b2
        _const_spec((LAYERS, 1, FF)),                                    # b1
        _const_spec((2, EMB)),                                           # final LN
        _const_spec((NUM_EXTRA, EMB, HEAD_PAD)),                         # clf heads (padded)
    ]

    out = pl.pallas_call(
        vit_kernel,
        out_shape=jax.ShapeDtypeStruct((num_tiles, NUM_EXTRA, rows, HEAD_PAD), jnp.float32),
        grid=(num_tiles,),
        in_specs=in_specs,
        out_specs=pl.BlockSpec((1, NUM_EXTRA, rows, HEAD_PAD), lambda t: (t, 0, 0, 0)),
        compiler_params=pltpu.CompilerParams(dimension_semantics=("parallel",)),
    )(patches, base, mask, w_emb, w_in, w2, ln_vec, bqkv, bmisc, bff, lnf, w_head)

    # select the class-token rows / real classes / real batch in the wrapper
    out = out.reshape(num_tiles, NUM_EXTRA, b_tile, SEQ, HEAD_PAD)
    logits = []
    for t in range(NUM_EXTRA):
        lt = out[:, t, :, N_PATCH + t, :NUM_CLASSES].reshape(Bp, NUM_CLASSES)
        logits.append(lt[:B])
    # forward() returns a list: one logits tensor per classification head
    return logits


def vit_reference(x, params):
    """Pure-JAX f32 reference mirroring the module math (for correctness checking)."""
    b = x.shape[0]
    patches = extract_patches(x)
    emb = jnp.einsum("bnk,kd->bnd", patches, params["w_emb"])
    cls = jnp.broadcast_to(params["cls"][None], (b, NUM_EXTRA, EMB))
    seq = jnp.concatenate([emb, cls], axis=1) + params["pos"][None]

    def ln(z, g, bb, eps):
        mu = z.mean(-1, keepdims=True)
        var = ((z - mu) ** 2).mean(-1, keepdims=True)
        return (z - mu) / jnp.sqrt(var + eps) * g + bb

    for l in range(LAYERS):
        h = ln(seq, params["ln1_g"][l], params["ln1_b"][l], LN_EPS)
        q = h @ params["wq"][l] + params["bq"][l]
        k = h @ params["wk"][l] + params["bk"][l]
        v = h @ params["wv"][l] + params["bv"][l]
        qh = q.reshape(b, SEQ, HEADS, HEAD_DIM).transpose(0, 2, 1, 3)
        kh = k.reshape(b, SEQ, HEADS, HEAD_DIM).transpose(0, 2, 1, 3)
        vh = v.reshape(b, SEQ, HEADS, HEAD_DIM).transpose(0, 2, 1, 3)
        s = jnp.einsum("bhqd,bhkd->bhqk", qh, kh) / math.sqrt(HEAD_DIM)
        p = jax.nn.softmax(s, axis=-1)
        o = jnp.einsum("bhqk,bhkd->bhqd", p, vh).transpose(0, 2, 1, 3).reshape(b, SEQ, EMB)
        seq = seq + o @ params["wo"][l] + params["bo"][l]
        h2 = ln(seq, params["ln2_g"][l], params["ln2_b"][l], LN_EPS)
        f = _gelu(h2 @ params["w1"][l] + params["b1"][l]) @ params["w2"][l] + params["b2"][l]
        seq = seq + f

    xf = ln(seq, params["lnf_g"], params["lnf_b"], FINAL_EPS)
    toks = xf[:, N_PATCH:, :]
    return [toks[:, t, :] @ params["w_head"][t] for t in range(NUM_EXTRA)]


if __name__ == "__main__":
    key = jax.random.PRNGKey(0)
    kx, kp = jax.random.split(key)
    x = jax.random.normal(kx, (2, IN_CH, IMG_H, IMG_W), jnp.float32)
    params = init_params(kp)

    outs = vit_forward(x, params)
    outs = [jax.block_until_ready(o) for o in outs]
    assert len(outs) == NUM_EXTRA and outs[0].shape == (2, NUM_CLASSES)

    refs = vit_reference(x, params)
    for got, ref in zip(outs, refs):
        assert jnp.allclose(got, ref, atol=2e-2, rtol=2e-2), (got, ref)

    print("KERNEL_OK")
</pallas_src>

<mosaic_0001>
module attributes {stable_mosaic.version = 11 : i64} {
  func.func @vit_kernel(%arg0: i32, %arg1: memref<1x5x256xbf16, #tpu.memory_space<vmem>>, %arg2: memref<5x32xf32, #tpu.memory_space<vmem>>, %arg3: memref<5x5xf32, #tpu.memory_space<vmem>>, %arg4: memref<256x32xbf16, #tpu.memory_space<vmem>>, %arg5: memref<2x32x192xbf16, #tpu.memory_space<vmem>>, %arg6: memref<2x64x32xbf16, #tpu.memory_space<vmem>>, %arg7: memref<2x4x32xf32, #tpu.memory_space<vmem>>, %arg8: memref<2x1x96xf32, #tpu.memory_space<vmem>>, %arg9: memref<2x2x32xf32, #tpu.memory_space<vmem>>, %arg10: memref<2x1x64xf32, #tpu.memory_space<vmem>>, %arg11: memref<2x32xf32, #tpu.memory_space<vmem>>, %arg12: memref<1x32x128xbf16, #tpu.memory_space<vmem>>, %arg13: memref<1x1x5x128xf32, #tpu.memory_space<vmem>>) attributes {dimension_semantics = [#tpu.dimension_semantics<parallel>], iteration_bounds = array<i64: 2>, scalar_prefetch = 0 : i64, scratch_operands = 0 : i64, tpu.core_type = #tpu.core_type<tc>, window_params = [{transform_indices = @transform_0, window_bounds = array<i64: 1, 5, 256>}, {pipeline_mode = #tpu.pipeline_mode<synchronous>, transform_indices = @transform_1, window_bounds = array<i64: 5, 32>}, {pipeline_mode = #tpu.pipeline_mode<synchronous>, transform_indices = @transform_2, window_bounds = array<i64: 5, 5>}, {pipeline_mode = #tpu.pipeline_mode<synchronous>, transform_indices = @transform_3, window_bounds = array<i64: 256, 32>}, {pipeline_mode = #tpu.pipeline_mode<synchronous>, transform_indices = @transform_4, window_bounds = array<i64: 2, 32, 192>}, {pipeline_mode = #tpu.pipeline_mode<synchronous>, transform_indices = @transform_5, window_bounds = array<i64: 2, 64, 32>}, {pipeline_mode = #tpu.pipeline_mode<synchronous>, transform_indices = @transform_6, window_bounds = array<i64: 2, 4, 32>}, {pipeline_mode = #tpu.pipeline_mode<synchronous>, transform_indices = @transform_7, window_bounds = array<i64: 2, 1, 96>}, {pipeline_mode = #tpu.pipeline_mode<synchronous>, transform_indices = @transform_8, window_bounds = array<i64: 2, 2, 32>}, {pipeline_mode = #tpu.pipeline_mode<synchronous>, transform_indices = @transform_9, window_bounds = array<i64: 2, 1, 64>}, {pipeline_mode = #tpu.pipeline_mode<synchronous>, transform_indices = @transform_10, window_bounds = array<i64: 2, 32>}, {pipeline_mode = #tpu.pipeline_mode<synchronous>, transform_indices = @transform_11, window_bounds = array<i64: 1, 32, 128>}, {transform_indices = @transform_12, window_bounds = array<i64: 1, 1, 5, 128>}]} {
    %c0 = arith.constant 0 : index
    %c0_0 = arith.constant 0 : index
    %c0_1 = arith.constant 0 : index
    %0 = vector.load %arg1[%c0, %c0_0, %c0_1] : memref<1x5x256xbf16, #tpu.memory_space<vmem>>, vector<1x5x256xbf16>
    %1 = vector.shape_cast %0 : vector<1x5x256xbf16> to vector<5x256xbf16>
    %c0_2 = arith.constant 0 : index
    %c0_3 = arith.constant 0 : index
    %2 = vector.load %arg4[%c0_2, %c0_3] : memref<256x32xbf16, #tpu.memory_space<vmem>>, vector<256x32xbf16>
    %cst = arith.constant dense<0.000000e+00> : vector<5x32xf32>
    %3 = tpu.matmul %1, %2, %cst {dimension_numbers = #tpu.dot_dimension_numbers<[1], [0], [0], [1], [0, 0, 1, 1], [], []>} : vector<5x256xbf16>, vector<256x32xbf16>, vector<5x32xf32> -> vector<5x32xf32>
    %c0_4 = arith.constant 0 : index
    %c0_5 = arith.constant 0 : index
    %4 = vector.load %arg2[%c0_4, %c0_5] : memref<5x32xf32, #tpu.memory_space<vmem>>, vector<5x32xf32>
    %5 = arith.addf %3, %4 : vector<5x32xf32>
    %c0_6 = arith.constant 0 : index
    %c0_7 = arith.constant 0 : index
    %6 = vector.load %arg3[%c0_6, %c0_7] : memref<5x5xf32, #tpu.memory_space<vmem>>, vector<5x5xf32>
    %c0_8 = arith.constant 0 : index
    %c0_9 = arith.constant 0 : index
    %c0_10 = arith.constant 0 : index
    %7 = vector.load %arg5[%c0_8, %c0_9, %c0_10] : memref<2x32x192xbf16, #tpu.memory_space<vmem>>, vector<1x32x192xbf16>
    %8 = vector.shape_cast %7 : vector<1x32x192xbf16> to vector<32x192xbf16>
    %9 = vector.extract_strided_slice %8 {offsets = [0, 0], sizes = [32, 96], strides = [1, 1]} : vector<32x192xbf16> to vector<32x96xbf16>
    %10 = vector.extract_strided_slice %8 {offsets = [0, 96], sizes = [32, 32], strides = [1, 1]} : vector<32x192xbf16> to vector<32x32xbf16>
    %11 = vector.extract_strided_slice %8 {offsets = [0, 128], sizes = [32, 64], strides = [1, 1]} : vector<32x192xbf16> to vector<32x64xbf16>
    %c0_11 = arith.constant 0 : index
    %c0_12 = arith.constant 0 : index
    %c0_13 = arith.constant 0 : index
    %12 = vector.load %arg7[%c0_11, %c0_12, %c0_13] : memref<2x4x32xf32, #tpu.memory_space<vmem>>, vector<1x4x32xf32>
    %13 = vector.shape_cast %12 : vector<1x4x32xf32> to vector<4x32xf32>
    %c0_14 = arith.constant 0 : index
    %c0_15 = arith.constant 0 : index
    %c0_16 = arith.constant 0 : index
    %14 = vector.load %arg9[%c0_14, %c0_15, %c0_16] : memref<2x2x32xf32, #tpu.memory_space<vmem>>, vector<1x2x32xf32>
    %15 = vector.shape_cast %14 : vector<1x2x32xf32> to vector<2x32xf32>
    %16 = vector.extract_strided_slice %13 {offsets = [0, 0], sizes = [1, 32], strides = [1, 1]} : vector<4x32xf32> to vector<1x32xf32>
    %17 = vector.extract_strided_slice %13 {offsets = [1, 0], sizes = [1, 32], strides = [1, 1]} : vector<4x32xf32> to vector<1x32xf32>
    %cst_17 = arith.constant dense<0.000000e+00> : vector<5xf32>
    %18 = vector.multi_reduction <add>, %5, %cst_17 [1] : vector<5x32xf32> to vector<5xf32>
    %19 = vector.shape_cast %18 : vector<5xf32> to vector<5x1xf32>
    %cst_18 = arith.constant 3.200000e+01 : f32
    %20 = vector.broadcast %cst_18 : f32 to vector<5x1xf32>
    %21 = arith.divf %19, %20 : vector<5x1xf32>
    %22 = vector.broadcast %21 : vector<5x1xf32> to vector<5x32xf32>
    %23 = arith.subf %5, %22 : vector<5x32xf32>
    %24 = arith.mulf %23, %23 : vector<5x32xf32>
    %cst_19 = arith.constant dense<0.000000e+00> : vector<5xf32>
    %25 = vector.multi_reduction <add>, %24, %cst_19 [1] : vector<5x32xf32> to vector<5xf32>
    %26 = vector.shape_cast %25 : vector<5xf32> to vector<5x1xf32>
    %cst_20 = arith.constant 3.200000e+01 : f32
    %27 = vector.broadcast %cst_20 : f32 to vector<5x1xf32>
    %28 = arith.divf %26, %27 : vector<5x1xf32>
    %29 = vector.broadcast %21 : vector<5x1xf32> to vector<5x32xf32>
    %30 = arith.subf %5, %29 : vector<5x32xf32>
    %cst_21 = arith.constant 9.99999974E-6 : f32
    %31 = vector.broadcast %cst_21 : f32 to vector<5x1xf32>
    %32 = arith.addf %28, %31 : vector<5x1xf32>
    %33 = math.rsqrt %32 : vector<5x1xf32>
    %34 = vector.broadcast %33 : vector<5x1xf32> to vector<5x32xf32>
    %35 = arith.mulf %30, %34 : vector<5x32xf32>
    %36 = vector.broadcast %16 : vector<1x32xf32> to vector<5x32xf32>
    %37 = arith.mulf %35, %36 : vector<5x32xf32>
    %38 = vector.broadcast %17 : vector<1x32xf32> to vector<5x32xf32>
    %39 = arith.addf %37, %38 : vector<5x32xf32>
    %40 = arith.truncf %39 : vector<5x32xf32> to vector<5x32xbf16>
    %cst_22 = arith.constant dense<0.000000e+00> : vector<5x96xf32>
    %41 = tpu.matmul %40, %9, %cst_22 {dimension_numbers = #tpu.dot_dimension_numbers<[1], [0], [0], [1], [0, 0, 1, 1], [], []>} : vector<5x32xbf16>, vector<32x96xbf16>, vector<5x96xf32> -> vector<5x96xf32>
    %c0_23 = arith.constant 0 : index
    %c0_24 = arith.constant 0 : index
    %c0_25 = arith.constant 0 : index
    %42 = vector.load %arg8[%c0_23, %c0_24, %c0_25] : memref<2x1x96xf32, #tpu.memory_space<vmem>>, vector<1x1x96xf32>
    %43 = vector.shape_cast %42 : vector<1x1x96xf32> to vector<1x96xf32>
    %44 = vector.broadcast %43 : vector<1x96xf32> to vector<5x96xf32>
    %45 = arith.addf %41, %44 : vector<5x96xf32>
    %46 = vector.extract_strided_slice %45 {offsets = [0, 0], sizes = [5, 8], strides = [1, 1]} : vector<5x96xf32> to vector<5x8xf32>
    %cst_26 = arith.constant 0.353553385 : f32
    %47 = vector.broadcast %cst_26 : f32 to vector<5x8xf32>
    %48 = arith.mulf %46, %47 : vector<5x8xf32>
    %49 = arith.truncf %48 : vector<5x8xf32> to vector<5x8xbf16>
    %50 = vector.extract_strided_slice %45 {offsets = [0, 32], sizes = [5, 8], strides = [1, 1]} : vector<5x96xf32> to vector<5x8xf32>
    %51 = arith.truncf %50 : vector<5x8xf32> to vector<5x8xbf16>
    %52 = vector.extract_strided_slice %45 {offsets = [0, 64], sizes = [5, 8], strides = [1, 1]} : vector<5x96xf32> to vector<5x8xf32>
    %53 = arith.truncf %52 : vector<5x8xf32> to vector<5x8xbf16>
    %cst_27 = arith.constant dense<0.000000e+00> : vector<5x5xf32>
    %54 = tpu.matmul %49, %51, %cst_27 {dimension_numbers = #tpu.dot_dimension_numbers<[1], [1], [0], [0], [0, 0, 1, 0], [], []>} : vector<5x8xbf16>, vector<5x8xbf16>, vector<5x5xf32> -> vector<5x5xf32>
    %55 = arith.addf %54, %6 : vector<5x5xf32>
    %cst_28 = arith.constant dense<0xFF800000> : vector<5xf32>
    %56 = vector.multi_reduction <maximumf>, %55, %cst_28 [1] : vector<5x5xf32> to vector<5xf32>
    %57 = vector.shape_cast %56 : vector<5xf32> to vector<5x1xf32>
    %58 = vector.broadcast %57 : vector<5x1xf32> to vector<5x5xf32>
    %59 = arith.subf %55, %58 : vector<5x5xf32>
    %60 = math.exp %59 : vector<5x5xf32>
    %cst_29 = arith.constant dense<0.000000e+00> : vector<5xf32>
    %61 = vector.multi_reduction <add>, %60, %cst_29 [1] : vector<5x5xf32> to vector<5xf32>
    %62 = vector.shape_cast %61 : vector<5xf32> to vector<5x1xf32>
    %63 = tpu.reciprocal %62 {approx = true} : vector<5x1xf32> -> vector<5x1xf32>
    %64 = vector.broadcast %63 : vector<5x1xf32> to vector<5x5xf32>
    %65 = arith.mulf %60, %64 : vector<5x5xf32>
    %66 = arith.truncf %65 : vector<5x5xf32> to vector<5x5xbf16>
    %cst_30 = arith.constant dense<0.000000e+00> : vector<5x8xf32>
    %67 = tpu.matmul %66, %53, %cst_30 {dimension_numbers = #tpu.dot_dimension_numbers<[1], [0], [0], [1], [0, 0, 1, 1], [], []>} : vector<5x5xbf16>, vector<5x8xbf16>, vector<5x8xf32> -> vector<5x8xf32>
    %68 = vector.extract_strided_slice %45 {offsets = [0, 8], sizes = [5, 8], strides = [1, 1]} : vector<5x96xf32> to vector<5x8xf32>
    %cst_31 = arith.constant 0.353553385 : f32
    %69 = vector.broadcast %cst_31 : f32 to vector<5x8xf32>
    %70 = arith.mulf %68, %69 : vector<5x8xf32>
    %71 = arith.truncf %70 : vector<5x8xf32> to vector<5x8xbf16>
    %72 = vector.extract_strided_slice %45 {offsets = [0, 40], sizes = [5, 8], strides = [1, 1]} : vector<5x96xf32> to vector<5x8xf32>
    %73 = arith.truncf %72 : vector<5x8xf32> to vector<5x8xbf16>
    %74 = vector.extract_strided_slice %45 {offsets = [0, 72], sizes = [5, 8], strides = [1, 1]} : vector<5x96xf32> to vector<5x8xf32>
    %75 = arith.truncf %74 : vector<5x8xf32> to vector<5x8xbf16>
    %cst_32 = arith.constant dense<0.000000e+00> : vector<5x5xf32>
    %76 = tpu.matmul %71, %73, %cst_32 {dimension_numbers = #tpu.dot_dimension_numbers<[1], [1], [0], [0], [0, 0, 1, 0], [], []>} : vector<5x8xbf16>, vector<5x8xbf16>, vector<5x5xf32> -> vector<5x5xf32>
    %77 = arith.addf %76, %6 : vector<5x5xf32>
    %cst_33 = arith.constant dense<0xFF800000> : vector<5xf32>
    %78 = vector.multi_reduction <maximumf>, %77, %cst_33 [1] : vector<5x5xf32> to vector<5xf32>
    %79 = vector.shape_cast %78 : vector<5xf32> to vector<5x1xf32>
    %80 = vector.broadcast %79 : vector<5x1xf32> to vector<5x5xf32>
    %81 = arith.subf %77, %80 : vector<5x5xf32>
    %82 = math.exp %81 : vector<5x5xf32>
    %cst_34 = arith.constant dense<0.000000e+00> : vector<5xf32>
    %83 = vector.multi_reduction <add>, %82, %cst_34 [1] : vector<5x5xf32> to vector<5xf32>
    %84 = vector.shape_cast %83 : vector<5xf32> to vector<5x1xf32>
    %85 = tpu.reciprocal %84 {approx = true} : vector<5x1xf32> -> vector<5x1xf32>
    %86 = vector.broadcast %85 : vector<5x1xf32> to vector<5x5xf32>
    %87 = arith.mulf %82, %86 : vector<5x5xf32>
    %88 = arith.truncf %87 : vector<5x5xf32> to vector<5x5xbf16>
    %cst_35 = arith.constant dense<0.000000e+00> : vector<5x8xf32>
    %89 = tpu.matmul %88, %75, %cst_35 {dimension_numbers = #tpu.dot_dimension_numbers<[1], [0], [0], [1], [0, 0, 1, 1], [], []>} : vector<5x5xbf16>, vector<5x8xbf16>, vector<5x8xf32> -> vector<5x8xf32>
    %90 = vector.extract_strided_slice %45 {offsets = [0, 16], sizes = [5, 8], strides = [1, 1]} : vector<5x96xf32> to vector<5x8xf32>
    %cst_36 = arith.constant 0.353553385 : f32
    %91 = vector.broadcast %cst_36 : f32 to vector<5x8xf32>
    %92 = arith.mulf %90, %91 : vector<5x8xf32>
    %93 = arith.truncf %92 : vector<5x8xf32> to vector<5x8xbf16>
    %94 = vector.extract_strided_slice %45 {offsets = [0, 48], sizes = [5, 8], strides = [1, 1]} : vector<5x96xf32> to vector<5x8xf32>
    %95 = arith.truncf %94 : vector<5x8xf32> to vector<5x8xbf16>
    %96 = vector.extract_strided_slice %45 {offsets = [0, 80], sizes = [5, 8], strides = [1, 1]} : vector<5x96xf32> to vector<5x8xf32>
    %97 = arith.truncf %96 : vector<5x8xf32> to vector<5x8xbf16>
    %cst_37 = arith.constant dense<0.000000e+00> : vector<5x5xf32>
    %98 = tpu.matmul %93, %95, %cst_37 {dimension_numbers = #tpu.dot_dimension_numbers<[1], [1], [0], [0], [0, 0, 1, 0], [], []>} : vector<5x8xbf16>, vector<5x8xbf16>, vector<5x5xf32> -> vector<5x5xf32>
    %99 = arith.addf %98, %6 : vector<5x5xf32>
    %cst_38 = arith.constant dense<0xFF800000> : vector<5xf32>
    %100 = vector.multi_reduction <maximumf>, %99, %cst_38 [1] : vector<5x5xf32> to vector<5xf32>
    %101 = vector.shape_cast %100 : vector<5xf32> to vector<5x1xf32>
    %102 = vector.broadcast %101 : vector<5x1xf32> to vector<5x5xf32>
    %103 = arith.subf %99, %102 : vector<5x5xf32>
    %104 = math.exp %103 : vector<5x5xf32>
    %cst_39 = arith.constant dense<0.000000e+00> : vector<5xf32>
    %105 = vector.multi_reduction <add>, %104, %cst_39 [1] : vector<5x5xf32> to vector<5xf32>
    %106 = vector.shape_cast %105 : vector<5xf32> to vector<5x1xf32>
    %107 = tpu.reciprocal %106 {approx = true} : vector<5x1xf32> -> vector<5x1xf32>
    %108 = vector.broadcast %107 : vector<5x1xf32> to vector<5x5xf32>
    %109 = arith.mulf %104, %108 : vector<5x5xf32>
    %110 = arith.truncf %109 : vector<5x5xf32> to vector<5x5xbf16>
    %cst_40 = arith.constant dense<0.000000e+00> : vector<5x8xf32>
    %111 = tpu.matmul %110, %97, %cst_40 {dimension_numbers = #tpu.dot_dimension_numbers<[1], [0], [0], [1], [0, 0, 1, 1], [], []>} : vector<5x5xbf16>, vector<5x8xbf16>, vector<5x8xf32> -> vector<5x8xf32>
    %112 = vector.extract_strided_slice %45 {offsets = [0, 24], sizes = [5, 8], strides = [1, 1]} : vector<5x96xf32> to vector<5x8xf32>
    %cst_41 = arith.constant 0.353553385 : f32
    %113 = vector.broadcast %cst_41 : f32 to vector<5x8xf32>
    %114 = arith.mulf %112, %113 : vector<5x8xf32>
    %115 = arith.truncf %114 : vector<5x8xf32> to vector<5x8xbf16>
    %116 = vector.extract_strided_slice %45 {offsets = [0, 56], sizes = [5, 8], strides = [1, 1]} : vector<5x96xf32> to vector<5x8xf32>
    %117 = arith.truncf %116 : vector<5x8xf32> to vector<5x8xbf16>
    %118 = vector.extract_strided_slice %45 {offsets = [0, 88], sizes = [5, 8], strides = [1, 1]} : vector<5x96xf32> to vector<5x8xf32>
    %119 = arith.truncf %118 : vector<5x8xf32> to vector<5x8xbf16>
    %cst_42 = arith.constant dense<0.000000e+00> : vector<5x5xf32>
    %120 = tpu.matmul %115, %117, %cst_42 {dimension_numbers = #tpu.dot_dimension_numbers<[1], [1], [0], [0], [0, 0, 1, 0], [], []>} : vector<5x8xbf16>, vector<5x8xbf16>, vector<5x5xf32> -> vector<5x5xf32>
    %121 = arith.addf %120, %6 : vector<5x5xf32>
    %cst_43 = arith.constant dense<0xFF800000> : vector<5xf32>
    %122 = vector.multi_reduction <maximumf>, %121, %cst_43 [1] : vector<5x5xf32> to vector<5xf32>
    %123 = vector.shape_cast %122 : vector<5xf32> to vector<5x1xf32>
    %124 = vector.broadcast %123 : vector<5x1xf32> to vector<5x5xf32>
    %125 = arith.subf %121, %124 : vector<5x5xf32>
    %126 = math.exp %125 : vector<5x5xf32>
    %cst_44 = arith.constant dense<0.000000e+00> : vector<5xf32>
    %127 = vector.multi_reduction <add>, %126, %cst_44 [1] : vector<5x5xf32> to vector<5xf32>
    %128 = vector.shape_cast %127 : vector<5xf32> to vector<5x1xf32>
    %129 = tpu.reciprocal %128 {approx = true} : vector<5x1xf32> -> vector<5x1xf32>
    %130 = vector.broadcast %129 : vector<5x1xf32> to vector<5x5xf32>
    %131 = arith.mulf %126, %130 : vector<5x5xf32>
    %132 = arith.truncf %131 : vector<5x5xf32> to vector<5x5xbf16>
    %cst_45 = arith.constant dense<0.000000e+00> : vector<5x8xf32>
    %133 = tpu.matmul %132, %119, %cst_45 {dimension_numbers = #tpu.dot_dimension_numbers<[1], [0], [0], [1], [0, 0, 1, 1], [], []>} : vector<5x5xbf16>, vector<5x8xbf16>, vector<5x8xf32> -> vector<5x8xf32>
    %134 = tpu.concatenate %67, %89, %111, %133 in 1 : vector<5x8xf32>, vector<5x8xf32>, vector<5x8xf32>, vector<5x8xf32> -> vector<5x32xf32>
    %135 = arith.truncf %134 : vector<5x32xf32> to vector<5x32xbf16>
    %cst_46 = arith.constant dense<0.000000e+00> : vector<5x32xf32>
    %136 = tpu.matmul %135, %10, %cst_46 {dimension_numbers = #tpu.dot_dimension_numbers<[1], [0], [0], [1], [0, 0, 1, 1], [], []>} : vector<5x32xbf16>, vector<32x32xbf16>, vector<5x32xf32> -> vector<5x32xf32>
    %137 = vector.extract_strided_slice %15 {offsets = [0, 0], sizes = [1, 32], strides = [1, 1]} : vector<2x32xf32> to vector<1x32xf32>
    %138 = vector.broadcast %137 : vector<1x32xf32> to vector<5x32xf32>
    %139 = arith.addf %136, %138 : vector<5x32xf32>
    %140 = arith.addf %5, %139 : vector<5x32xf32>
    %141 = vector.extract_strided_slice %13 {offsets = [2, 0], sizes = [1, 32], strides = [1, 1]} : vector<4x32xf32> to vector<1x32xf32>
    %142 = vector.extract_strided_slice %13 {offsets = [3, 0], sizes = [1, 32], strides = [1, 1]} : vector<4x32xf32> to vector<1x32xf32>
    %cst_47 = arith.constant dense<0.000000e+00> : vector<5xf32>
    %143 = vector.multi_reduction <add>, %140, %cst_47 [1] : vector<5x32xf32> to vector<5xf32>
    %144 = vector.shape_cast %143 : vector<5xf32> to vector<5x1xf32>
    %cst_48 = arith.constant 3.200000e+01 : f32
    %145 = vector.broadcast %cst_48 : f32 to vector<5x1xf32>
    %146 = arith.divf %144, %145 : vector<5x1xf32>
    %147 = vector.broadcast %146 : vector<5x1xf32> to vector<5x32xf32>
    %148 = arith.subf %140, %147 : vector<5x32xf32>
    %149 = arith.mulf %148, %148 : vector<5x32xf32>
    %cst_49 = arith.constant dense<0.000000e+00> : vector<5xf32>
    %150 = vector.multi_reduction <add>, %149, %cst_49 [1] : vector<5x32xf32> to vector<5xf32>
    %151 = vector.shape_cast %150 : vector<5xf32> to vector<5x1xf32>
    %cst_50 = arith.constant 3.200000e+01 : f32
    %152 = vector.broadcast %cst_50 : f32 to vector<5x1xf32>
    %153 = arith.divf %151, %152 : vector<5x1xf32>
    %154 = vector.broadcast %146 : vector<5x1xf32> to vector<5x32xf32>
    %155 = arith.subf %140, %154 : vector<5x32xf32>
    %cst_51 = arith.constant 9.99999974E-6 : f32
    %156 = vector.broadcast %cst_51 : f32 to vector<5x1xf32>
    %157 = arith.addf %153, %156 : vector<5x1xf32>
    %158 = math.rsqrt %157 : vector<5x1xf32>
    %159 = vector.broadcast %158 : vector<5x1xf32> to vector<5x32xf32>
    %160 = arith.mulf %155, %159 : vector<5x32xf32>
    %161 = vector.broadcast %141 : vector<1x32xf32> to vector<5x32xf32>
    %162 = arith.mulf %160, %161 : vector<5x32xf32>
    %163 = vector.broadcast %142 : vector<1x32xf32> to vector<5x32xf32>
    %164 = arith.addf %162, %163 : vector<5x32xf32>
    %165 = arith.truncf %164 : vector<5x32xf32> to vector<5x32xbf16>
    %cst_52 = arith.constant dense<0.000000e+00> : vector<5x64xf32>
    %166 = tpu.matmul %165, %11, %cst_52 {dimension_numbers = #tpu.dot_dimension_numbers<[1], [0], [0], [1], [0, 0, 1, 1], [], []>} : vector<5x32xbf16>, vector<32x64xbf16>, vector<5x64xf32> -> vector<5x64xf32>
    %c0_53 = arith.constant 0 : index
    %c0_54 = arith.constant 0 : index
    %c0_55 = arith.constant 0 : index
    %167 = vector.load %arg10[%c0_53, %c0_54, %c0_55] : memref<2x1x64xf32, #tpu.memory_space<vmem>>, vector<1x1x64xf32>
    %168 = vector.shape_cast %167 : vector<1x1x64xf32> to vector<1x64xf32>
    %169 = vector.broadcast %168 : vector<1x64xf32> to vector<5x64xf32>
    %170 = arith.addf %166, %169 : vector<5x64xf32>
    %cst_56 = arith.constant 5.000000e-01 : f32
    %171 = vector.broadcast %cst_56 : f32 to vector<5x64xf32>
    %172 = arith.mulf %171, %170 : vector<5x64xf32>
    %cst_57 = arith.constant 4.471500e-02 : f32
    %173 = vector.broadcast %cst_57 : f32 to vector<5x64xf32>
    %174 = arith.mulf %173, %170 : vector<5x64xf32>
    %175 = arith.mulf %174, %170 : vector<5x64xf32>
    %176 = arith.mulf %175, %170 : vector<5x64xf32>
    %177 = arith.addf %170, %176 : vector<5x64xf32>
    %cst_58 = arith.constant 0.797884583 : f32
    %178 = vector.broadcast %cst_58 : f32 to vector<5x64xf32>
    %179 = arith.mulf %178, %177 : vector<5x64xf32>
    %180 = math.tanh %179 : vector<5x64xf32>
    %cst_59 = arith.constant 1.000000e+00 : f32
    %181 = vector.broadcast %cst_59 : f32 to vector<5x64xf32>
    %182 = arith.addf %181, %180 : vector<5x64xf32>
    %183 = arith.mulf %172, %182 : vector<5x64xf32>
    %184 = arith.truncf %183 : vector<5x64xf32> to vector<5x64xbf16>
    %c0_60 = arith.constant 0 : index
    %c0_61 = arith.constant 0 : index
    %c0_62 = arith.constant 0 : index
    %185 = vector.load %arg6[%c0_60, %c0_61, %c0_62] : memref<2x64x32xbf16, #tpu.memory_space<vmem>>, vector<1x64x32xbf16>
    %186 = vector.shape_cast %185 : vector<1x64x32xbf16> to vector<64x32xbf16>
    %cst_63 = arith.constant dense<0.000000e+00> : vector<5x32xf32>
    %187 = tpu.matmul %184, %186, %cst_63 {dimension_numbers = #tpu.dot_dimension_numbers<[1], [0], [0], [1], [0, 0, 1, 1], [], []>} : vector<5x64xbf16>, vector<64x32xbf16>, vector<5x32xf32> -> vector<5x32xf32>
    %188 = vector.extract_strided_slice %15 {offsets = [1, 0], sizes = [1, 32], strides = [1, 1]} : vector<2x32xf32> to vector<1x32xf32>
    %189 = vector.broadcast %188 : vector<1x32xf32> to vector<5x32xf32>
    %190 = arith.addf %187, %189 : vector<5x32xf32>
    %191 = arith.addf %140, %190 : vector<5x32xf32>
    %c1 = arith.constant 1 : index
    %c0_64 = arith.constant 0 : index
    %c0_65 = arith.constant 0 : index
    %192 = vector.load %arg5[%c1, %c0_64, %c0_65] : memref<2x32x192xbf16, #tpu.memory_space<vmem>>, vector<1x32x192xbf16>
    %193 = vector.shape_cast %192 : vector<1x32x192xbf16> to vector<32x192xbf16>
    %194 = vector.extract_strided_slice %193 {offsets = [0, 0], sizes = [32, 96], strides = [1, 1]} : vector<32x192xbf16> to vector<32x96xbf16>
    %195 = vector.extract_strided_slice %193 {offsets = [0, 96], sizes = [32, 32], strides = [1, 1]} : vector<32x192xbf16> to vector<32x32xbf16>
    %196 = vector.extract_strided_slice %193 {offsets = [0, 128], sizes = [32, 64], strides = [1, 1]} : vector<32x192xbf16> to vector<32x64xbf16>
    %c1_66 = arith.constant 1 : index
    %c0_67 = arith.constant 0 : index
    %c0_68 = arith.constant 0 : index
    %197 = vector.load %arg7[%c1_66, %c0_67, %c0_68] : memref<2x4x32xf32, #tpu.memory_space<vmem>>, vector<1x4x32xf32>
    %198 = vector.shape_cast %197 : vector<1x4x32xf32> to vector<4x32xf32>
    %c1_69 = arith.constant 1 : index
    %c0_70 = arith.constant 0 : index
    %c0_71 = arith.constant 0 : index
    %199 = vector.load %arg9[%c1_69, %c0_70, %c0_71] : memref<2x2x32xf32, #tpu.memory_space<vmem>>, vector<1x2x32xf32>
    %200 = vector.shape_cast %199 : vector<1x2x32xf32> to vector<2x32xf32>
    %201 = vector.extract_strided_slice %198 {offsets = [0, 0], sizes = [1, 32], strides = [1, 1]} : vector<4x32xf32> to vector<1x32xf32>
    %202 = vector.extract_strided_slice %198 {offsets = [1, 0], sizes = [1, 32], strides = [1, 1]} : vector<4x32xf32> to vector<1x32xf32>
    %cst_72 = arith.constant dense<0.000000e+00> : vector<5xf32>
    %203 = vector.multi_reduction <add>, %191, %cst_72 [1] : vector<5x32xf32> to vector<5xf32>
    %204 = vector.shape_cast %203 : vector<5xf32> to vector<5x1xf32>
    %cst_73 = arith.constant 3.200000e+01 : f32
    %205 = vector.broadcast %cst_73 : f32 to vector<5x1xf32>
    %206 = arith.divf %204, %205 : vector<5x1xf32>
    %207 = vector.broadcast %206 : vector<5x1xf32> to vector<5x32xf32>
    %208 = arith.subf %191, %207 : vector<5x32xf32>
    %209 = arith.mulf %208, %208 : vector<5x32xf32>
    %cst_74 = arith.constant dense<0.000000e+00> : vector<5xf32>
    %210 = vector.multi_reduction <add>, %209, %cst_74 [1] : vector<5x32xf32> to vector<5xf32>
    %211 = vector.shape_cast %210 : vector<5xf32> to vector<5x1xf32>
    %cst_75 = arith.constant 3.200000e+01 : f32
    %212 = vector.broadcast %cst_75 : f32 to vector<5x1xf32>
    %213 = arith.divf %211, %212 : vector<5x1xf32>
    %214 = vector.broadcast %206 : vector<5x1xf32> to vector<5x32xf32>
    %215 = arith.subf %191, %214 : vector<5x32xf32>
    %cst_76 = arith.constant 9.99999974E-6 : f32
    %216 = vector.broadcast %cst_76 : f32 to vector<5x1xf32>
    %217 = arith.addf %213, %216 : vector<5x1xf32>
    %218 = math.rsqrt %217 : vector<5x1xf32>
    %219 = vector.broadcast %218 : vector<5x1xf32> to vector<5x32xf32>
    %220 = arith.mulf %215, %219 : vector<5x32xf32>
    %221 = vector.broadcast %201 : vector<1x32xf32> to vector<5x32xf32>
    %222 = arith.mulf %220, %221 : vector<5x32xf32>
    %223 = vector.broadcast %202 : vector<1x32xf32> to vector<5x32xf32>
    %224 = arith.addf %222, %223 : vector<5x32xf32>
    %225 = arith.truncf %224 : vector<5x32xf32> to vector<5x32xbf16>
    %cst_77 = arith.constant dense<0.000000e+00> : vector<5x96xf32>
    %226 = tpu.matmul %225, %194, %cst_77 {dimension_numbers = #tpu.dot_dimension_numbers<[1], [0], [0], [1], [0, 0, 1, 1], [], []>} : vector<5x32xbf16>, vector<32x96xbf16>, vector<5x96xf32> -> vector<5x96xf32>
    %c1_78 = arith.constant 1 : index
    %c0_79 = arith.constant 0 : index
    %c0_80 = arith.constant 0 : index
    %227 = vector.load %arg8[%c1_78, %c0_79, %c0_80] : memref<2x1x96xf32, #tpu.memory_space<vmem>>, vector<1x1x96xf32>
    %228 = vector.shape_cast %227 : vector<1x1x96xf32> to vector<1x96xf32>
    %229 = vector.broadcast %228 : vector<1x96xf32> to vector<5x96xf32>
    %230 = arith.addf %226, %229 : vector<5x96xf32>
    %231 = vector.extract_strided_slice %230 {offsets = [0, 0], sizes = [5, 8], strides = [1, 1]} : vector<5x96xf32> to vector<5x8xf32>
    %cst_81 = arith.constant 0.353553385 : f32
    %232 = vector.broadcast %cst_81 : f32 to vector<5x8xf32>
    %233 = arith.mulf %231, %232 : vector<5x8xf32>
    %234 = arith.truncf %233 : vector<5x8xf32> to vector<5x8xbf16>
    %235 = vector.extract_strided_slice %230 {offsets = [0, 32], sizes = [5, 8], strides = [1, 1]} : vector<5x96xf32> to vector<5x8xf32>
    %236 = arith.truncf %235 : vector<5x8xf32> to vector<5x8xbf16>
    %237 = vector.extract_strided_slice %230 {offsets = [0, 64], sizes = [5, 8], strides = [1, 1]} : vector<5x96xf32> to vector<5x8xf32>
    %238 = arith.truncf %237 : vector<5x8xf32> to vector<5x8xbf16>
    %cst_82 = arith.constant dense<0.000000e+00> : vector<5x5xf32>
    %239 = tpu.matmul %234, %236, %cst_82 {dimension_numbers = #tpu.dot_dimension_numbers<[1], [1], [0], [0], [0, 0, 1, 0], [], []>} : vector<5x8xbf16>, vector<5x8xbf16>, vector<5x5xf32> -> vector<5x5xf32>
    %240 = arith.addf %239, %6 : vector<5x5xf32>
    %cst_83 = arith.constant dense<0xFF800000> : vector<5xf32>
    %241 = vector.multi_reduction <maximumf>, %240, %cst_83 [1] : vector<5x5xf32> to vector<5xf32>
    %242 = vector.shape_cast %241 : vector<5xf32> to vector<5x1xf32>
    %243 = vector.broadcast %242 : vector<5x1xf32> to vector<5x5xf32>
    %244 = arith.subf %240, %243 : vector<5x5xf32>
    %245 = math.exp %244 : vector<5x5xf32>
    %cst_84 = arith.constant dense<0.000000e+00> : vector<5xf32>
    %246 = vector.multi_reduction <add>, %245, %cst_84 [1] : vector<5x5xf32> to vector<5xf32>
    %247 = vector.shape_cast %246 : vector<5xf32> to vector<5x1xf32>
    %248 = tpu.reciprocal %247 {approx = true} : vector<5x1xf32> -> vector<5x1xf32>
    %249 = vector.broadcast %248 : vector<5x1xf32> to vector<5x5xf32>
    %250 = arith.mulf %245, %249 : vector<5x5xf32>
    %251 = arith.truncf %250 : vector<5x5xf32> to vector<5x5xbf16>
    %cst_85 = arith.constant dense<0.000000e+00> : vector<5x8xf32>
    %252 = tpu.matmul %251, %238, %cst_85 {dimension_numbers = #tpu.dot_dimension_numbers<[1], [0], [0], [1], [0, 0, 1, 1], [], []>} : vector<5x5xbf16>, vector<5x8xbf16>, vector<5x8xf32> -> vector<5x8xf32>
    %253 = vector.extract_strided_slice %230 {offsets = [0, 8], sizes = [5, 8], strides = [1, 1]} : vector<5x96xf32> to vector<5x8xf32>
    %cst_86 = arith.constant 0.353553385 : f32
    %254 = vector.broadcast %cst_86 : f32 to vector<5x8xf32>
    %255 = arith.mulf %253, %254 : vector<5x8xf32>
    %256 = arith.truncf %255 : vector<5x8xf32> to vector<5x8xbf16>
    %257 = vector.extract_strided_slice %230 {offsets = [0, 40], sizes = [5, 8], strides = [1, 1]} : vector<5x96xf32> to vector<5x8xf32>
    %258 = arith.truncf %257 : vector<5x8xf32> to vector<5x8xbf16>
    %259 = vector.extract_strided_slice %230 {offsets = [0, 72], sizes = [5, 8], strides = [1, 1]} : vector<5x96xf32> to vector<5x8xf32>
    %260 = arith.truncf %259 : vector<5x8xf32> to vector<5x8xbf16>
    %cst_87 = arith.constant dense<0.000000e+00> : vector<5x5xf32>
    %261 = tpu.matmul %256, %258, %cst_87 {dimension_numbers = #tpu.dot_dimension_numbers<[1], [1], [0], [0], [0, 0, 1, 0], [], []>} : vector<5x8xbf16>, vector<5x8xbf16>, vector<5x5xf32> -> vector<5x5xf32>
    %262 = arith.addf %261, %6 : vector<5x5xf32>
    %cst_88 = arith.constant dense<0xFF800000> : vector<5xf32>
    %263 = vector.multi_reduction <maximumf>, %262, %cst_88 [1] : vector<5x5xf32> to vector<5xf32>
    %264 = vector.shape_cast %263 : vector<5xf32> to vector<5x1xf32>
    %265 = vector.broadcast %264 : vector<5x1xf32> to vector<5x5xf32>
    %266 = arith.subf %262, %265 : vector<5x5xf32>
    %267 = math.exp %266 : vector<5x5xf32>
    %cst_89 = arith.constant dense<0.000000e+00> : vector<5xf32>
    %268 = vector.multi_reduction <add>, %267, %cst_89 [1] : vector<5x5xf32> to vector<5xf32>
    %269 = vector.shape_cast %268 : vector<5xf32> to vector<5x1xf32>
    %270 = tpu.reciprocal %269 {approx = true} : vector<5x1xf32> -> vector<5x1xf32>
    %271 = vector.broadcast %270 : vector<5x1xf32> to vector<5x5xf32>
    %272 = arith.mulf %267, %271 : vector<5x5xf32>
    %273 = arith.truncf %272 : vector<5x5xf32> to vector<5x5xbf16>
    %cst_90 = arith.constant dense<0.000000e+00> : vector<5x8xf32>
    %274 = tpu.matmul %273, %260, %cst_90 {dimension_numbers = #tpu.dot_dimension_numbers<[1], [0], [0], [1], [0, 0, 1, 1], [], []>} : vector<5x5xbf16>, vector<5x8xbf16>, vector<5x8xf32> -> vector<5x8xf32>
    %275 = vector.extract_strided_slice %230 {offsets = [0, 16], sizes = [5, 8], strides = [1, 1]} : vector<5x96xf32> to vector<5x8xf32>
    %cst_91 = arith.constant 0.353553385 : f32
    %276 = vector.broadcast %cst_91 : f32 to vector<5x8xf32>
    %277 = arith.mulf %275, %276 : vector<5x8xf32>
    %278 = arith.truncf %277 : vector<5x8xf32> to vector<5x8xbf16>
    %279 = vector.extract_strided_slice %230 {offsets = [0, 48], sizes = [5, 8], strides = [1, 1]} : vector<5x96xf32> to vector<5x8xf32>
    %280 = arith.truncf %279 : vector<5x8xf32> to vector<5x8xbf16>
    %281 = vector.extract_strided_slice %230 {offsets = [0, 80], sizes = [5, 8], strides = [1, 1]} : vector<5x96xf32> to vector<5x8xf32>
    %282 = arith.truncf %281 : vector<5x8xf32> to vector<5x8xbf16>
    %cst_92 = arith.constant dense<0.000000e+00> : vector<5x5xf32>
    %283 = tpu.matmul %278, %280, %cst_92 {dimension_numbers = #tpu.dot_dimension_numbers<[1], [1], [0], [0], [0, 0, 1, 0], [], []>} : vector<5x8xbf16>, vector<5x8xbf16>, vector<5x5xf32> -> vector<5x5xf32>
    %284 = arith.addf %283, %6 : vector<5x5xf32>
    %cst_93 = arith.constant dense<0xFF800000> : vector<5xf32>
    %285 = vector.multi_reduction <maximumf>, %284, %cst_93 [1] : vector<5x5xf32> to vector<5xf32>
    %286 = vector.shape_cast %285 : vector<5xf32> to vector<5x1xf32>
    %287 = vector.broadcast %286 : vector<5x1xf32> to vector<5x5xf32>
    %288 = arith.subf %284, %287 : vector<5x5xf32>
    %289 = math.exp %288 : vector<5x5xf32>
    %cst_94 = arith.constant dense<0.000000e+00> : vector<5xf32>
    %290 = vector.multi_reduction <add>, %289, %cst_94 [1] : vector<5x5xf32> to vector<5xf32>
    %291 = vector.shape_cast %290 : vector<5xf32> to vector<5x1xf32>
    %292 = tpu.reciprocal %291 {approx = true} : vector<5x1xf32> -> vector<5x1xf32>
    %293 = vector.broadcast %292 : vector<5x1xf32> to vector<5x5xf32>
    %294 = arith.mulf %289, %293 : vector<5x5xf32>
    %295 = arith.truncf %294 : vector<5x5xf32> to vector<5x5xbf16>
    %cst_95 = arith.constant dense<0.000000e+00> : vector<5x8xf32>
    %296 = tpu.matmul %295, %282, %cst_95 {dimension_numbers = #tpu.dot_dimension_numbers<[1], [0], [0], [1], [0, 0, 1, 1], [], []>} : vector<5x5xbf16>, vector<5x8xbf16>, vector<5x8xf32> -> vector<5x8xf32>
    %297 = vector.extract_strided_slice %230 {offsets = [0, 24], sizes = [5, 8], strides = [1, 1]} : vector<5x96xf32> to vector<5x8xf32>
    %cst_96 = arith.constant 0.353553385 : f32
    %298 = vector.broadcast %cst_96 : f32 to vector<5x8xf32>
    %299 = arith.mulf %297, %298 : vector<5x8xf32>
    %300 = arith.truncf %299 : vector<5x8xf32> to vector<5x8xbf16>
    %301 = vector.extract_strided_slice %230 {offsets = [0, 56], sizes = [5, 8], strides = [1, 1]} : vector<5x96xf32> to vector<5x8xf32>
    %302 = arith.truncf %301 : vector<5x8xf32> to vector<5x8xbf16>
    %303 = vector.extract_strided_slice %230 {offsets = [0, 88], sizes = [5, 8], strides = [1, 1]} : vector<5x96xf32> to vector<5x8xf32>
    %304 = arith.truncf %303 : vector<5x8xf32> to vector<5x8xbf16>
    %cst_97 = arith.constant dense<0.000000e+00> : vector<5x5xf32>
    %305 = tpu.matmul %300, %302, %cst_97 {dimension_numbers = #tpu.dot_dimension_numbers<[1], [1], [0], [0], [0, 0, 1, 0], [], []>} : vector<5x8xbf16>, vector<5x8xbf16>, vector<5x5xf32> -> vector<5x5xf32>
    %306 = arith.addf %305, %6 : vector<5x5xf32>
    %cst_98 = arith.constant dense<0xFF800000> : vector<5xf32>
    %307 = vector.multi_reduction <maximumf>, %306, %cst_98 [1] : vector<5x5xf32> to vector<5xf32>
    %308 = vector.shape_cast %307 : vector<5xf32> to vector<5x1xf32>
    %309 = vector.broadcast %308 : vector<5x1xf32> to vector<5x5xf32>
    %310 = arith.subf %306, %309 : vector<5x5xf32>
    %311 = math.exp %310 : vector<5x5xf32>
    %cst_99 = arith.constant dense<0.000000e+00> : vector<5xf32>
    %312 = vector.multi_reduction <add>, %311, %cst_99 [1] : vector<5x5xf32> to vector<5xf32>
    %313 = vector.shape_cast %312 : vector<5xf32> to vector<5x1xf32>
    %314 = tpu.reciprocal %313 {approx = true} : vector<5x1xf32> -> vector<5x1xf32>
    %315 = vector.broadcast %314 : vector<5x1xf32> to vector<5x5xf32>
    %316 = arith.mulf %311, %315 : vector<5x5xf32>
    %317 = arith.truncf %316 : vector<5x5xf32> to vector<5x5xbf16>
    %cst_100 = arith.constant dense<0.000000e+00> : vector<5x8xf32>
    %318 = tpu.matmul %317, %304, %cst_100 {dimension_numbers = #tpu.dot_dimension_numbers<[1], [0], [0], [1], [0, 0, 1, 1], [], []>} : vector<5x5xbf16>, vector<5x8xbf16>, vector<5x8xf32> -> vector<5x8xf32>
    %319 = tpu.concatenate %252, %274, %296, %318 in 1 : vector<5x8xf32>, vector<5x8xf32>, vector<5x8xf32>, vector<5x8xf32> -> vector<5x32xf32>
    %320 = arith.truncf %319 : vector<5x32xf32> to vector<5x32xbf16>
    %cst_101 = arith.constant dense<0.000000e+00> : vector<5x32xf32>
    %321 = tpu.matmul %320, %195, %cst_101 {dimension_numbers = #tpu.dot_dimension_numbers<[1], [0], [0], [1], [0, 0, 1, 1], [], []>} : vector<5x32xbf16>, vector<32x32xbf16>, vector<5x32xf32> -> vector<5x32xf32>
    %322 = vector.extract_strided_slice %200 {offsets = [0, 0], sizes = [1, 32], strides = [1, 1]} : vector<2x32xf32> to vector<1x32xf32>
    %323 = vector.broadcast %322 : vector<1x32xf32> to vector<5x32xf32>
    %324 = arith.addf %321, %323 : vector<5x32xf32>
    %325 = arith.addf %191, %324 : vector<5x32xf32>
    %326 = vector.extract_strided_slice %198 {offsets = [2, 0], sizes = [1, 32], strides = [1, 1]} : vector<4x32xf32> to vector<1x32xf32>
    %327 = vector.extract_strided_slice %198 {offsets = [3, 0], sizes = [1, 32], strides = [1, 1]} : vector<4x32xf32> to vector<1x32xf32>
    %cst_102 = arith.constant dense<0.000000e+00> : vector<5xf32>
    %328 = vector.multi_reduction <add>, %325, %cst_102 [1] : vector<5x32xf32> to vector<5xf32>
    %329 = vector.shape_cast %328 : vector<5xf32> to vector<5x1xf32>
    %cst_103 = arith.constant 3.200000e+01 : f32
    %330 = vector.broadcast %cst_103 : f32 to vector<5x1xf32>
    %331 = arith.divf %329, %330 : vector<5x1xf32>
    %332 = vector.broadcast %331 : vector<5x1xf32> to vector<5x32xf32>
    %333 = arith.subf %325, %332 : vector<5x32xf32>
    %334 = arith.mulf %333, %333 : vector<5x32xf32>
    %cst_104 = arith.constant dense<0.000000e+00> : vector<5xf32>
    %335 = vector.multi_reduction <add>, %334, %cst_104 [1] : vector<5x32xf32> to vector<5xf32>
    %336 = vector.shape_cast %335 : vector<5xf32> to vector<5x1xf32>
    %cst_105 = arith.constant 3.200000e+01 : f32
    %337 = vector.broadcast %cst_105 : f32 to vector<5x1xf32>
    %338 = arith.divf %336, %337 : vector<5x1xf32>
    %339 = vector.broadcast %331 : vector<5x1xf32> to vector<5x32xf32>
    %340 = arith.subf %325, %339 : vector<5x32xf32>
    %cst_106 = arith.constant 9.99999974E-6 : f32
    %341 = vector.broadcast %cst_106 : f32 to vector<5x1xf32>
    %342 = arith.addf %338, %341 : vector<5x1xf32>
    %343 = math.rsqrt %342 : vector<5x1xf32>
    %344 = vector.broadcast %343 : vector<5x1xf32> to vector<5x32xf32>
    %345 = arith.mulf %340, %344 : vector<5x32xf32>
    %346 = vector.broadcast %326 : vector<1x32xf32> to vector<5x32xf32>
    %347 = arith.mulf %345, %346 : vector<5x32xf32>
    %348 = vector.broadcast %327 : vector<1x32xf32> to vector<5x32xf32>
    %349 = arith.addf %347, %348 : vector<5x32xf32>
    %350 = arith.truncf %349 : vector<5x32xf32> to vector<5x32xbf16>
    %cst_107 = arith.constant dense<0.000000e+00> : vector<5x64xf32>
    %351 = tpu.matmul %350, %196, %cst_107 {dimension_numbers = #tpu.dot_dimension_numbers<[1], [0], [0], [1], [0, 0, 1, 1], [], []>} : vector<5x32xbf16>, vector<32x64xbf16>, vector<5x64xf32> -> vector<5x64xf32>
    %c1_108 = arith.constant 1 : index
    %c0_109 = arith.constant 0 : index
    %c0_110 = arith.constant 0 : index
    %352 = vector.load %arg10[%c1_108, %c0_109, %c0_110] : memref<2x1x64xf32, #tpu.memory_space<vmem>>, vector<1x1x64xf32>
    %353 = vector.shape_cast %352 : vector<1x1x64xf32> to vector<1x64xf32>
    %354 = vector.broadcast %353 : vector<1x64xf32> to vector<5x64xf32>
    %355 = arith.addf %351, %354 : vector<5x64xf32>
    %cst_111 = arith.constant 5.000000e-01 : f32
    %356 = vector.broadcast %cst_111 : f32 to vector<5x64xf32>
    %357 = arith.mulf %356, %355 : vector<5x64xf32>
    %cst_112 = arith.constant 4.471500e-02 : f32
    %358 = vector.broadcast %cst_112 : f32 to vector<5x64xf32>
    %359 = arith.mulf %358, %355 : vector<5x64xf32>
    %360 = arith.mulf %359, %355 : vector<5x64xf32>
    %361 = arith.mulf %360, %355 : vector<5x64xf32>
    %362 = arith.addf %355, %361 : vector<5x64xf32>
    %cst_113 = arith.constant 0.797884583 : f32
    %363 = vector.broadcast %cst_113 : f32 to vector<5x64xf32>
    %364 = arith.mulf %363, %362 : vector<5x64xf32>
    %365 = math.tanh %364 : vector<5x64xf32>
    %cst_114 = arith.constant 1.000000e+00 : f32
    %366 = vector.broadcast %cst_114 : f32 to vector<5x64xf32>
    %367 = arith.addf %366, %365 : vector<5x64xf32>
    %368 = arith.mulf %357, %367 : vector<5x64xf32>
    %369 = arith.truncf %368 : vector<5x64xf32> to vector<5x64xbf16>
    %c1_115 = arith.constant 1 : index
    %c0_116 = arith.constant 0 : index
    %c0_117 = arith.constant 0 : index
    %370 = vector.load %arg6[%c1_115, %c0_116, %c0_117] : memref<2x64x32xbf16, #tpu.memory_space<vmem>>, vector<1x64x32xbf16>
    %371 = vector.shape_cast %370 : vector<1x64x32xbf16> to vector<64x32xbf16>
    %cst_118 = arith.constant dense<0.000000e+00> : vector<5x32xf32>
    %372 = tpu.matmul %369, %371, %cst_118 {dimension_numbers = #tpu.dot_dimension_numbers<[1], [0], [0], [1], [0, 0, 1, 1], [], []>} : vector<5x64xbf16>, vector<64x32xbf16>, vector<5x32xf32> -> vector<5x32xf32>
    %373 = vector.extract_strided_slice %200 {offsets = [1, 0], sizes = [1, 32], strides = [1, 1]} : vector<2x32xf32> to vector<1x32xf32>
    %374 = vector.broadcast %373 : vector<1x32xf32> to vector<5x32xf32>
    %375 = arith.addf %372, %374 : vector<5x32xf32>
    %376 = arith.addf %325, %375 : vector<5x32xf32>
    %c0_119 = arith.constant 0 : index
    %c0_120 = arith.constant 0 : index
    %377 = vector.load %arg11[%c0_119, %c0_120] : memref<2x32xf32, #tpu.memory_space<vmem>>, vector<1x32xf32>
    %c1_121 = arith.constant 1 : index
    %c0_122 = arith.constant 0 : index
    %378 = vector.load %arg11[%c1_121, %c0_122] : memref<2x32xf32, #tpu.memory_space<vmem>>, vector<1x32xf32>
    %cst_123 = arith.constant dense<0.000000e+00> : vector<5xf32>
    %379 = vector.multi_reduction <add>, %376, %cst_123 [1] : vector<5x32xf32> to vector<5xf32>
    %380 = vector.shape_cast %379 : vector<5xf32> to vector<5x1xf32>
    %cst_124 = arith.constant 3.200000e+01 : f32
    %381 = vector.broadcast %cst_124 : f32 to vector<5x1xf32>
    %382 = arith.divf %380, %381 : vector<5x1xf32>
    %383 = vector.broadcast %382 : vector<5x1xf32> to vector<5x32xf32>
    %384 = arith.subf %376, %383 : vector<5x32xf32>
    %385 = arith.mulf %384, %384 : vector<5x32xf32>
    %cst_125 = arith.constant dense<0.000000e+00> : vector<5xf32>
    %386 = vector.multi_reduction <add>, %385, %cst_125 [1] : vector<5x32xf32> to vector<5xf32>
    %387 = vector.shape_cast %386 : vector<5xf32> to vector<5x1xf32>
    %cst_126 = arith.constant 3.200000e+01 : f32
    %388 = vector.broadcast %cst_126 : f32 to vector<5x1xf32>
    %389 = arith.divf %387, %388 : vector<5x1xf32>
    %390 = vector.broadcast %382 : vector<5x1xf32> to vector<5x32xf32>
    %391 = arith.subf %376, %390 : vector<5x32xf32>
    %cst_127 = arith.constant 9.99999997E-7 : f32
    %392 = vector.broadcast %cst_127 : f32 to vector<5x1xf32>
    %393 = arith.addf %389, %392 : vector<5x1xf32>
    %394 = math.rsqrt %393 : vector<5x1xf32>
    %395 = vector.broadcast %394 : vector<5x1xf32> to vector<5x32xf32>
    %396 = arith.mulf %391, %395 : vector<5x32xf32>
    %397 = vector.broadcast %377 : vector<1x32xf32> to vector<5x32xf32>
    %398 = arith.mulf %396, %397 : vector<5x32xf32>
    %399 = vector.broadcast %378 : vector<1x32xf32> to vector<5x32xf32>
    %400 = arith.addf %398, %399 : vector<5x32xf32>
    %401 = arith.truncf %400 : vector<5x32xf32> to vector<5x32xbf16>
    %c0_128 = arith.constant 0 : index
    %c0_129 = arith.constant 0 : index
    %c0_130 = arith.constant 0 : index
    %402 = vector.load %arg12[%c0_128, %c0_129, %c0_130] : memref<1x32x128xbf16, #tpu.memory_space<vmem>>, vector<1x32x128xbf16>
    %403 = vector.shape_cast %402 : vector<1x32x128xbf16> to vector<32x128xbf16>
    %cst_131 = arith.constant dense<0.000000e+00> : vector<5x128xf32>
    %404 = tpu.matmul %401, %403, %cst_131 {dimension_numbers = #tpu.dot_dimension_numbers<[1], [0], [0], [1], [0, 0, 1, 1], [], []>} : vector<5x32xbf16>, vector<32x128xbf16>, vector<5x128xf32> -> vector<5x128xf32>
    %c0_132 = arith.constant 0 : index
    %c0_133 = arith.constant 0 : index
    %c0_134 = arith.constant 0 : index
    %c0_135 = arith.constant 0 : index
    %405 = vector.load %arg13[%c0_132, %c0_133, %c0_134, %c0_135] : memref<1x1x5x128xf32, #tpu.memory_space<vmem>>, vector<1x1x5x128xf32>
    %406 = vector.shape_cast %405 : vector<1x1x5x128xf32> to vector<5x128xf32>
    %407 = vector.shape_cast %404 : vector<5x128xf32> to vector<1x1x5x128xf32>
    tpu.vector_store %arg13[%c0_132, %c0_133, %c0_134, %c0_135], %407 {strides = array<i32>} : memref<1x1x5x128xf32, #tpu.memory_space<vmem>>, vector<1x1x5x128xf32>,
    return
  }
  func.func @transform_0(%arg0: i32) -> (i32, i32, i32) {
    %c0_i32 = arith.constant 0 : i32
    %c0_i32_0 = arith.constant 0 : i32
    %c0_i32_1 = arith.constant 0 : i32
    return %arg0, %c0_i32, %c0_i32_0 : i32, i32, i32
  }
  func.func @transform_1(%arg0: i32) -> (i32, i32) {
    %c0_i32 = arith.constant 0 : i32
    %c0_i32_0 = arith.constant 0 : i32
    %c0_i32_1 = arith.constant 0 : i32
    return %c0_i32, %c0_i32_0 : i32, i32
  }
  func.func @transform_2(%arg0: i32) -> (i32, i32) {
    %c0_i32 = arith.constant 0 : i32
    %c0_i32_0 = arith.constant 0 : i32
    %c0_i32_1 = arith.constant 0 : i32
    return %c0_i32, %c0_i32_0 : i32, i32
  }
  func.func @transform_3(%arg0: i32) -> (i32, i32) {
    %c0_i32 = arith.constant 0 : i32
    %c0_i32_0 = arith.constant 0 : i32
    %c0_i32_1 = arith.constant 0 : i32
    return %c0_i32, %c0_i32_0 : i32, i32
  }
  func.func @transform_4(%arg0: i32) -> (i32, i32, i32) {
    %c0_i32 = arith.constant 0 : i32
    %c0_i32_0 = arith.constant 0 : i32
    %c0_i32_1 = arith.constant 0 : i32
    %c0_i32_2 = arith.constant 0 : i32
    return %c0_i32, %c0_i32_0, %c0_i32_1 : i32, i32, i32
  }
  func.func @transform_5(%arg0: i32) -> (i32, i32, i32) {
    %c0_i32 = arith.constant 0 : i32
    %c0_i32_0 = arith.constant 0 : i32
    %c0_i32_1 = arith.constant 0 : i32
    %c0_i32_2 = arith.constant 0 : i32
    return %c0_i32, %c0_i32_0, %c0_i32_1 : i32, i32, i32
  }
  func.func @transform_6(%arg0: i32) -> (i32, i32, i32) {
    %c0_i32 = arith.constant 0 : i32
    %c0_i32_0 = arith.constant 0 : i32
    %c0_i32_1 = arith.constant 0 : i32
    %c0_i32_2 = arith.constant 0 : i32
    return %c0_i32, %c0_i32_0, %c0_i32_1 : i32, i32, i32
  }
  func.func @transform_7(%arg0: i32) -> (i32, i32, i32) {
    %c0_i32 = arith.constant 0 : i32
    %c0_i32_0 = arith.constant 0 : i32
    %c0_i32_1 = arith.constant 0 : i32
    %c0_i32_2 = arith.constant 0 : i32
    return %c0_i32, %c0_i32_0, %c0_i32_1 : i32, i32, i32
  }
  func.func @transform_8(%arg0: i32) -> (i32, i32, i32) {
    %c0_i32 = arith.constant 0 : i32
    %c0_i32_0 = arith.constant 0 : i32
    %c0_i32_1 = arith.constant 0 : i32
    %c0_i32_2 = arith.constant 0 : i32
    return %c0_i32, %c0_i32_0, %c0_i32_1 : i32, i32, i32
  }
  func.func @transform_9(%arg0: i32) -> (i32, i32, i32) {
    %c0_i32 = arith.constant 0 : i32
    %c0_i32_0 = arith.constant 0 : i32
    %c0_i32_1 = arith.constant 0 : i32
    %c0_i32_2 = arith.constant 0 : i32
    return %c0_i32, %c0_i32_0, %c0_i32_1 : i32, i32, i32
  }
  func.func @transform_10(%arg0: i32) -> (i32, i32) {
    %c0_i32 = arith.constant 0 : i32
    %c0_i32_0 = arith.constant 0 : i32
    %c0_i32_1 = arith.constant 0 : i32
    return %c0_i32, %c0_i32_0 : i32, i32
  }
  func.func @transform_11(%arg0: i32) -> (i32, i32, i32) {
    %c0_i32 = arith.constant 0 : i32
    %c0_i32_0 = arith.constant 0 : i32
    %c0_i32_1 = arith.constant 0 : i32
    %c0_i32_2 = arith.constant 0 : i32
    return %c0_i32, %c0_i32_0, %c0_i32_1 : i32, i32, i32
  }
  func.func @transform_12(%arg0: i32) -> (i32, i32, i32, i32) {
    %c0_i32 = arith.constant 0 : i32
    %c0_i32_0 = arith.constant 0 : i32
    %c0_i32_1 = arith.constant 0 : i32
    %c0_i32_2 = arith.constant 0 : i32
    return %arg0, %c0_i32, %c0_i32_0, %c0_i32_1 : i32, i32, i32, i32
  }
}

</mosaic_0001>

<bundles_post_ra>
// kernel: tpu_custom_call.1
= control target key start
LH: loop header
LB: loop body
LE: loop exit
PB: predicated region body
PF: predicated region fallthrough
CT: control target
= control target key end

     0   :  { %s2861_s21 = smov 0   ;;  %s3328_s0 = inlined_call_operand.vmem [shape: bf16[2,5,256], index: 0, kind: input, shape index: {}]   ;;  %s3329_s1 = inlined_call_operand.vmem [shape: f32[5,32], index: 1, kind: input, shape index: {}]   ;;  %s3330_s2 = inlined_call_operand.vmem [shape: f32[5,5], index: 2, kind: input, shape index: {}]   ;;  %s3331_s3 = inlined_call_operand.vmem [shape: bf16[256,32], index: 3, kind: input, shape index: {}]   ;;  %s3332_s4 = inlined_call_operand.vmem [shape: bf16[2,32,192], index: 4, kind: input, shape index: {}]   ;;  %s3333_s5 = inlined_call_operand.vmem [shape: bf16[2,64,32], index: 5, kind: input, shape index: {}]   ;;  %s3334_s6 = inlined_call_operand.vmem [shape: f32[2,4,32], index: 6, kind: input, shape index: {}]   ;;  %s3335_s7 = inlined_call_operand.vmem [shape: f32[2,1,96], index: 7, kind: input, shape index: {}]   ;;  %s3336_s8 = inlined_call_operand.vmem [shape: f32[2,2,32], index: 8, kind: input, shape index: {}]   ;;  %s3337_s9 = inlined_call_operand.vmem [shape: f32[2,1,64], index: 9, kind: input, shape index: {}]   ;;  %s3338_s10 = inlined_call_operand.vmem [shape: f32[2,32], index: 10, kind: input, shape index: {}]   ;;  %s3339_s11 = inlined_call_operand.vmem [shape: bf16[1,32,128], index: 11, kind: input, shape index: {}]   ;;  %s3340_s12 = inlined_call_operand.vmem [shape: f32[2,1,5,128], index: 12, kind: output, shape index: {}]  }
   0x1 LB: > { %s2303_s22 = sadd.s32 4294967295, %s2776_s21   ;;  %p2307_p0 = scmp.ge.s32.totalorder %s2776_s21, 1  ;;  %s2776_s21 = sphi %s2861_s21, %s22_s21  }
   0x2   : > { %p362_p1 = scmp.lt.s32.totalorder %s2776_s21, 3 }
   0x4   : > { %p363_p2 = pnand %p2307_p0, %p362_p1 }
   0x5   : > { %p403_p3 = scmp.lt.s32.totalorder (!%p363_p2), %s2303_s22, 1  ;;  %s2780_s23 = smov (!%p363_p2), 64  }
   0x6   : > { %366 = sbr.rel (%p363_p2) target bundleno = 6104 (0x17d8), region = 68  ;;  %s2781_s24 = smov (!%p363_p2), 96  }
   0x7   : > { %s2783_s27 = smov (!%p363_p2), 80   ;;  %s2785_s29 = smov (!%p363_p2), 120  }
   0x8   : > { %s2786_s30 = smov (!%p363_p2), 112   ;;  %s2787_s13 = smov (!%p363_p2), 72  }
   0x9   : > { %s2788_s14 = smov (!%p363_p2), 104   ;;  %s3348_s15 = smov (!%p363_p2), 48  }
   0xa   : > { %s3349_s16 = smov (!%p363_p2), 56   ;;  %s3347_s17 = smov (!%p363_p2), 40  }
   0xb   : > { %v2684_v0 = vld [vmem:[%s3331_s3 + $0x78] sm:$0xff]   ;;  %v2686_v2 = vld [vmem:[%s3331_s3 + $0x70] sm:$0xff]   ;;  %v2688_v4 = vld [vmem:[%s3331_s3 + $0x68] sm:$0xff]   ;;  %s3359_s22 = smov (!%p403_p3, %s2303_s22), 1  ;;  %vm597_vm0 = vcmask 258048   ;;  %v2778_v33 = vmov 0.0   ;;  %v612_v38 = vlaneseq }
   0xc   : > { %v2685_v1 = vld [vmem:[%s3331_s3 + $0x38] sm:$0xff]   ;;  %2397 = vmatprep.subr.bf16.mxu0 %v2684_v0  ;;  %v2687_v3 = vld [vmem:[%s3331_s3 + $0x30] sm:$0xff]   ;;  %v2689_v5 = vld [vmem:[%s3331_s3 + $0x28] sm:$0xff]   ;;  %s3341_s19 = sshll.u32 %s3359_s22, 3  ;;  %2482 = vmatprep.subr.bf16.mxu1 %v2778_v33  ;;  %vm2779_vm1 = vmmov 0   ;;  %vm642_vm2 = vcmask 261120  }
   0xd   : > { %2398 = vmatpush3.bf16.msra.mxu0 %v2685_v1  ;;  %v2690_v6 = vld [vmem:[%s3331_s3 + $0x60] sm:$0xff]   ;;  %v2692_v8 = vld [vmem:[%s3331_s3 + $0x58] sm:$0xff]   ;;  %s407_s28 = scalar_lea.vmem %s3328_s0, %s3341_s19  ;;  %v2694_v10 = vld [vmem:[%s3331_s3 + $0x50] sm:$0xff]   ;;  %2486 = vmatprep.mubr.msk.bf16.mxu1 %vm2779_vm1, %v2778_v33  ;;  %v2954_v39 = vshrl.u32 %v612_v38, 7  ;;  %vm692_vm3 = vcmask 64512   ;;  %vm758_vm4 = vcmask 1041408  }
   0xe   : > { %2399 = vmatprep.subr.bf16.mxu0 %v2686_v2  ;;  %v2691_v7 = vld [vmem:[%s3331_s3 + $0x20] sm:$0xff]   ;;  %v2693_v9 = vld [vmem:[%s3331_s3 + $0x18] sm:$0xff]   ;;  %v2695_v12 = vld [vmem:[%s3331_s3 + $0x10] sm:$0xff]   ;;  %vm759_vm5 = vcmask 1042432   ;;  %v2782_v59 = vmov 65535   ;;  %vm739_vm6 = vcmask 36864  }
   0xf   : > { %v413_v11 = vld [vmem:[%s407_s28] sm:$0x77]  ;;  %v2696_v14 = vld [vmem:[%s3331_s3 + $0x48] sm:$0xff]   ;;  %v2937_v32 = vld [vmem:[%s3332_s4 + $0x10] ss:$8 sps:$4 sm:$0xff]   ;;  %v2957_v40 = vsub.s32 0, %v2954_v39 }
  0x10   : > { %v2312_v13 = vcombine.high %v413_v11, %v413_v11  ;;  %v2697_v15 = vld [vmem:[%s3331_s3 + $0x8] sm:$0xff]   ;;  %v2698_v16 = vld [vmem:[%s3331_s3 + $0x40] sm:$0xff]   ;;  %v2311_v18 = vcombine.low %v413_v11, %v413_v11  ;;  %2483 = vmatpush3.bf16.msra.mxu1 %v2937_v32  ;;  %v2965_v42 = vsub.s32 1, %v2954_v39  ;;  %v760_v60 = vsel %vm758_vm4, 4294967295, %v2782_v59  ;;  %s2784_s28 = smov 88   ;;  %s3345_s19 = smov 32  }
  0x11   : > { %2400 = vmatpush3.bf16.msra.mxu0 %v2687_v3  ;;  %v2699_v17 = vld [vmem:[%s3331_s3] sm:$0xff]   ;;  %2484 = vmatprep.subr.bf16.mxu1 %v2778_v33  ;;  %v2985_v62 = vsel %vm759_vm5, %v760_v60, 0  ;;  %vm754_vm7 = vcmask 39936   ;;  %s3344_s18 = smov 8   ;;  %s3343_s20 = smov 16   ;;  %vm1149_vm8 = vcmask 130048  }
  0x12   : > { %2401 = vmatprep.subr.bf16.mxu0 %v2688_v4  ;;  %582 = vmatprep.mubr.bf16.mxu0 %v2312_v13  ;;  %v446_v20 = vld [vmem:[%s3329_s1] sm:$0x1f]  ;;  %s3342_s25 = smov 24   ;;  %vm1151_vm9 = vcmask 195584   ;;  %vm1336_vm10 = vcmask 523264  }
  0x13   : > { %v2946_v34 = vld [vmem:[%s3332_s4] ss:$8 sps:$4 sm:$0xff]  }
  0x14   : > { %2485 = vmatpush3.bf16.msra.mxu1 %v2946_v34  ;;  %v2962_v41 = vld [vmem:[%s3334_s6] sm:$0xf] }
  0x15   : > { %2402 = vmatpush3.bf16.msra.mxu0 %v2689_v5  ;;  %2490 = vmatprep.subr.bf16.mxu1 %v2778_v33  ;;  %v615_v43 = vrot.slane %v2962_v41, %v2957_v40  ;;  %v620_v46 = vrot.slane %v2962_v41, %v2965_v42  ;;  %v2329_v50 = vld [vmem:[%s3335_s7] ss:$0 sm:$0xff] }
  0x16   : > { %2403 = vmatprep.subr.bf16.mxu0 %v2690_v6  ;;  %v2995_v2 = vld [vmem:[%s3330_s2] sm:$0x1f] }
  0x19   : > { %2404 = vmatpush3.bf16.msra.mxu0 %v2691_v7 }
  0x1a   : > { %2405 = vmatprep.subr.bf16.mxu0 %v2692_v8 }
  0x1d   : > { %2406 = vmatpush3.bf16.msra.mxu0 %v2693_v9 }
  0x1e   : > { %2407 = vmatprep.subr.bf16.mxu0 %v2694_v10 }
  0x21   : > { %2408 = vmatpush3.bf16.msra.mxu0 %v2695_v12 }
  0x22   : > { %2409 = vmatprep.subr.bf16.mxu0 %v2696_v14 }
  0x25   : > { %2410 = vmatpush3.bf16.msra.mxu0 %v2697_v15 }
  0x26   : > { %2411 = vmatprep.subr.bf16.mxu0 %v2698_v16 }
  0x29   : > { %2412 = vmatpush3.bf16.msra.mxu0 %v2699_v17 }
  0x2a   : > { %2508 = vmatprep.subr.bf16.mxu0 %v2778_v33 }
  0x2c   : > { %583 = vmatmul.mubr.bf16.vlgmr.msra.gmra.mxu0 %v2311_v18 }
  0x2d   : > { %2510 = vmatprep.mubr.msk.bf16.mxu0 %vm2779_vm1, %v2778_v33 }
  0xec   : > { %v2413_v19 = vpop.f32.mrf.mxu0 }
  0xee   : > { %v2414_v21 = vpop.f32.mrf.mxu0 }
  0xef   : > { %v2415_v22 = vadd.f32 %v2414_v21, %v2413_v19 }
  0xf0   : > { %v2416_v23 = vpop.f32.mrf.mxu0 }
  0xf1   : > { %v2928_v24 = vadd.f32 %v2415_v22, %v446_v20 }
  0xf2   : > { %v2417_v25 = vpop.f32.mrf.mxu0 }
  0xf3   : > { %v598_v26 = vsel %vm597_vm0, %v2928_v24, 0.0 }
  0xf4   : > { %599 = vadd.xlane.f32.xlu0 %v598_v26 }
 0x17d   : > { %v600_v27 = vpop.xlane.xlu0 %599 }
 0x17e   : > { %v602_v28 = vmul.f32 0.03125, %v600_v27 }
 0x180   : > { %v603_v29 = vsub.f32 %v2928_v24, %v602_v28 }
 0x182   : > { %v604_v30 = vmul.f32 %v603_v29, %v603_v29 }
 0x184   : > { %v605_v31 = vsel %vm597_vm0, %v604_v30, 0.0 }
 0x185   : > { %606 = vadd.xlane.f32.xlu0 %v605_v31 }
 0x20e   : > { %v607_v35 = vpop.xlane.xlu0 %606 }
 0x20f   : > { %v608_v36 = vmul.f32 0.03125, %v607_v35 }
 0x211   : > { %v609_v37 = vadd.f32 1e-05, %v608_v36 }
 0x213   : > { %2724 = vrsqrt.f32 %v609_v37 }
 0x220   : > { %v2725_v44 = vpop.eup %2724 }
 0x221   : > { %v611_v45 = vmul.f32 %v2725_v44, %v603_v29 }
 0x223   : > { %v616_v47 = vmul.f32 %v615_v43, %v611_v45 }
 0x225   : > { %v621_v48 = vadd.f32 %v620_v46, %v616_v47 }
 0x227   : > { %v622_v49 = vpack.c.bf16 %v621_v48, %v621_v48 }
 0x229   : > { %2487 = vmatmul.mubr.msk.bf16.vlgmr.msra.gmra.mxu1 %vm642_vm2, %v622_v49 }
 0x22a   : > { %2492 = vmatprep.mubr.msk.bf16.mxu1 %vm2779_vm1, %v2778_v33 }
 0x2e9   : > { %v680_v51 = vpop.f32.mrf.mxu1 }
 0x2ea   : > { %v681_v52 = vadd.f32 %v2329_v50, %v680_v51 }
 0x2eb   : > { %v2488_v53 = vpop.f32.mrf.mxu1 }
 0x2ec   : > { %v2977_v54 = vpack.c.bf16 %v681_v52, %v681_v52  ;;  %v686_v61 = vmul.f32 0.35355338, %v681_v52 }
 0x2ed   : > { %v683_v55 = vpop.f32.mrf.mxu1 }
 0x2ee   : > { %752 = vrot.lane.b32.xlu0 %v2977_v54, %s2780_s23  ;;  %690 = vrot.lane.b32.xlu1 %v2977_v54, %s2781_s24  ;;  %v687_v0 = vpack.c.bf16 %v686_v61, %v686_v61 }
 0x2ef   : > { %v2489_v56 = vpop.f32.mrf.mxu1 }
 0x360   : > { %v691_v57 = vpop.permute.xlu1 %690  ;;  %v753_v63 = vpop.permute.xlu0 %752 }
 0x361   : > { %v697_v58 = vsel %vm692_vm3, %v691_v57, 0  ;;  %v763_v1 = vand.u32 %v2985_v62, %v753_v63 }
 0x362   : > { %2491 = vmatpush3.bf16.xpose.msra.mxu1 %v697_v58 }
 0x363   : > { %2496 = vmatprep.subr.bf16.mxu1 %v2778_v33 }
 0x369   : > { %2493 = vmatmul.mubr.msk.bf16.vlgmr.msra.gmra.mxu1 %vm692_vm3, %v687_v0 }
 0x36a   : > { %2497 = vmatpush3.bf16.msra.mxu1 %v763_v1  ;;  %2498 = vmatprep.mubr.msk.bf16.mxu1 %vm2779_vm1, %v2778_v33 }
 0x36b   : > { %2502 = vmatprep.subr.bf16.mxu1 %v2778_v33 }
 0x429   : > { %v733_v3 = vpop.f32.mrf.mxu1 }
 0x42a   : > { %v734_v4 = vadd.f32 %v733_v3, %v2995_v2 }
 0x42b   : > { %v2494_v5 = vpop.f32.mrf.mxu1 }
 0x42c   : > { %v740_v6 = vsel %vm739_vm6, %v734_v4, -inf }
 0x42d   : > { %741 = vmax.xlane.f32.xlu1 %v740_v6  ;;  %v736_v7 = vpop.f32.mrf.mxu1 }
 0x42f   : > { %v2495_v8 = vpop.f32.mrf.mxu1 }
 0x43e   : > { %918 = vrot.lane.b32.xlu1 %v2977_v54, %s2783_s27 }
 0x4b6   : > { %v742_v9 = vpop.xlane.xlu1 %741 }
 0x4b7   : > { %v743_v10 = vsub.f32 %v734_v4, %v742_v9 }
 0x4b9   : > { %v744_v11 = vmul.f32 1.442695, %v743_v10 }
 0x4ba   : > { %v919_v21 = vpop.permute.xlu1 %918 }
 0x4bb   : > { %2726 = vpow2.f32 %v744_v11  ;;  %v924_v23 = vsel %vm692_vm3, %v919_v21, 0 }
 0x4c8   : > { %v2727_v12 = vpop.eup %2726 }
 0x4c9   : > { %v746_v13 = vsel %vm739_vm6, %v2727_v12, 0.0 }
 0x4ca   : > { %747 = vadd.xlane.f32.xlu0 %v746_v13 }
 0x4e0   : > { %808 = vrot.lane.b32.xlu0 %v2977_v54, %s2784_s28 }
 0x4e4   : > { %806 = vrot.lane.b32.xlu0 %v687_v0, %s2785_s29 }
 0x4e8   : > { %916 = vrot.lane.b32.xlu0 %v687_v0, %s2786_s30 }
 0x4ec   : > { %1028 = vrot.lane.b32.xlu0 %v2977_v54, %s2787_s13 }
 0x4f0   : > { %1026 = vrot.lane.b32.xlu0 %v687_v0, %s2788_s14 }
 0x553   : > { %v748_v14 = vpop.xlane.xlu0 %747 }
 0x554   : > { %2728 = vrcp.f32 %v748_v14 }
 0x557   : > { %v809_v16 = vpop.permute.xlu0 %808 }
 0x558   : > { %v814_v19 = vsel %vm692_vm3, %v809_v16, 0 }
 0x55b   : > { %v807_v20 = vpop.permute.xlu0 %806 }
 0x55f   : > { %v917_v22 = vpop.permute.xlu0 %916 }
 0x561   : > { %v2729_v15 = vpop.eup %2728 }
 0x562   : > { %v750_v17 = vmul.f32 %v2729_v15, %v2727_v12 }
 0x563   : > { %v1029_v25 = vpop.permute.xlu0 %1028 }
 0x564   : > { %v751_v18 = vpack.c.bf16 %v750_v17, %v750_v17  ;;  %v1034_v26 = vsel %vm692_vm3, %v1029_v25, 0 }
 0x566   : > { %2499 = vmatmul.mubr.msk.bf16.vlgmr.msra.gmra.mxu1 %vm754_vm7, %v751_v18 }
 0x567   : > { %2503 = vmatpush3.bf16.xpose.msra.mxu1 %v814_v19  ;;  %2504 = vmatprep.mubr.msk.bf16.mxu1 %vm2779_vm1, %v2778_v33  ;;  %v1027_v27 = vpop.permute.xlu0 %1026 }
 0x568   : > { %2514 = vmatprep.subr.bf16.mxu1 %v2778_v33 }
 0x56e   : > { %2505 = vmatmul.mubr.msk.bf16.vlgmr.msra.gmra.mxu1 %vm692_vm3, %v807_v20 }
 0x56f   : > { %2515 = vmatpush3.bf16.xpose.msra.mxu1 %v924_v23  ;;  %2516 = vmatprep.mubr.msk.bf16.mxu1 %vm2779_vm1, %v2778_v33 }
 0x570   : > { %2526 = vmatprep.subr.bf16.mxu1 %v2778_v33 }
 0x576   : > { %2517 = vmatmul.mubr.msk.bf16.vlgmr.msra.gmra.mxu1 %vm692_vm3, %v917_v22 }
 0x577   : > { %2527 = vmatpush3.bf16.xpose.msra.mxu1 %v1034_v26  ;;  %2528 = vmatprep.mubr.msk.bf16.mxu1 %vm2779_vm1, %v2778_v33 }
 0x578   : > { %2538 = vmatprep.subr.bf16.mxu1 %v2778_v33 }
 0x57e   : > { %2529 = vmatmul.mubr.msk.bf16.vlgmr.msra.gmra.mxu1 %vm692_vm3, %v1027_v27 }
 0x57f   : > { %2542 = vmatprep.mubr.msk.bf16.mxu1 %vm2779_vm1, %v2778_v33 }
 0x626   : > { %v3027_v28 = vpop.f32.mrf.mxu1 }
 0x628   : > { %v2500_v29 = vpop.f32.mrf.mxu1 }
 0x629   : > { %v2704_v29 = vld [vmem:[%s3332_s4 + $0x14] ss:$8 sps:$4 sm:$0xff]  }
 0x62a   : > { %v802_v30 = vpop.f32.mrf.mxu1 }
 0x62c   : > { %v2501_v31 = vpop.f32.mrf.mxu1 }
 0x62d   : > { %v2707_v31 = vld [vmem:[%s3332_s4 + $0x4] ss:$8 sps:$4 sm:$0xff]  }
 0x62e   : > { %v850_v35 = vpop.f32.mrf.mxu1 }
 0x62f   : > { %v851_v36 = vadd.f32 %v850_v35, %v2995_v2 }
 0x630   : > { %v2506_v37 = vpop.f32.mrf.mxu1 }
 0x631   : > { %v856_v38 = vsel %vm739_vm6, %v851_v36, -inf }
 0x632   : > { %857 = vmax.xlane.f32.xlu0 %v856_v38  ;;  %v853_v43 = vpop.f32.mrf.mxu1 }
 0x634   : > { %v2507_v44 = vpop.f32.mrf.mxu1 }
 0x636   : > { %v960_v45 = vpop.f32.mrf.mxu1 }
 0x637   : > { %v961_v46 = vadd.f32 %v960_v45, %v2995_v2 }
 0x638   : > { %v2518_v47 = vpop.f32.mrf.mxu1 }
 0x639   : > { %v966_v48 = vsel %vm739_vm6, %v961_v46, -inf }
 0x63a   : > { %967 = vmax.xlane.f32.xlu1 %v966_v48  ;;  %v963_v49 = vpop.f32.mrf.mxu1 }
 0x63c   : > { %v2519_v50 = vpop.f32.mrf.mxu1 }
 0x63e   : > { %v1070_v51 = vpop.f32.mrf.mxu1 }
 0x63f   : > { %v1071_v52 = vadd.f32 %v1070_v51, %v2995_v2 }
 0x640   : > { %v2530_v53 = vpop.f32.mrf.mxu1 }
 0x641   : > { %v1076_v55 = vsel %vm739_vm6, %v1071_v52, -inf }
 0x642   : > { %1077 = vmax.xlane.f32.xlu0 %v1076_v55  ;;  %v1073_v56 = vpop.f32.mrf.mxu1 }
 0x644   : > { %v2531_v57 = vpop.f32.mrf.mxu1 }
 0x64b   : > { %978 = vrot.lane.b32.xlu1 %v2977_v54, %s3348_s15 }
 0x6bb   : > { %v858_v58 = vpop.xlane.xlu0 %857 }
 0x6bc   : > { %v859_v59 = vsub.f32 %v851_v36, %v858_v58 }
 0x6be   : > { %v860_v60 = vmul.f32 1.442695, %v859_v59  ;;  %v3086_v59 = vld [vmem:[%s3336_s8] sm:$0x3] }
 0x6c0   : > { %2730 = vpow2.f32 %v860_v60  ;;  %v1157_v60 = vrot.slane %v3086_v59, %v2957_v40 }
 0x6c3   : > { %v968_v61 = vpop.xlane.xlu1 %967 }
 0x6c4   : > { %v969_v63 = vsub.f32 %v961_v46, %v968_v61 }
 0x6c6   : > { %v970_v0 = vmul.f32 1.442695, %v969_v63 }
 0x6c7   : > { %v979_v13 = vpop.permute.xlu1 %978 }
 0x6c8   : > { %2732 = vpow2.f32 %v970_v0  ;;  %v984_v20 = vand.u32 %v979_v13, %v2985_v62  ;;  %v1223_v13 = vsub.s32 2, %v2954_v39 }
 0x6cb   : > { %v1078_v1 = vpop.xlane.xlu0 %1077 }
 0x6cc   : > { %v1079_v3 = vsub.f32 %v1071_v52, %v1078_v1 }
 0x6cd   : > { %v2731_v4 = vpop.eup %2730 }
 0x6ce   : > { %v1080_v5 = vmul.f32 1.442695, %v1079_v3  ;;  %v862_v6 = vsel %vm739_vm6, %v2731_v4, 0.0 }
 0x6cf   : > { %863 = vadd.xlane.f32.xlu0 %v862_v6 }
 0x6d0   : > { %2734 = vpow2.f32 %v1080_v5 }
 0x6d5   : > { %v2733_v7 = vpop.eup %2732 }
 0x6d6   : > { %v972_v8 = vsel %vm739_vm6, %v2733_v7, 0.0 }
 0x6d7   : > { %973 = vadd.xlane.f32.xlu0 %v972_v8 }
 0x6dd   : > { %v2735_v9 = vpop.eup %2734 }
 0x6de   : > { %v1082_v10 = vsel %vm739_vm6, %v2735_v9, 0.0 }
 0x6df   : > { %1083 = vadd.xlane.f32.xlu1 %v1082_v10 }
 0x6ed   : > { %868 = vrot.lane.b32.xlu0 %v2977_v54, %s3349_s16 }
 0x6f0   : > { %1088 = vrot.lane.b32.xlu1 %v2977_v54, %s3347_s17 }
 0x6f4   : > { %1160 = vrot.lane.b32.xlu1 %v2937_v32, %s3345_s19 }
 0x758   : > { %v864_v11 = vpop.xlane.xlu0 %863 }
 0x759   : > { %2736 = vrcp.f32 %v864_v11 }
 0x760   : > { %v974_v12 = vpop.xlane.xlu0 %973 }
 0x761   : > { %2738 = vrcp.f32 %v974_v12 }
 0x764   : > { %v869_v14 = vpop.permute.xlu0 %868 }
 0x765   : > { %v874_v15 = vand.u32 %v869_v14, %v2985_v62  ;;  %v1224_v14 = vrot.slane %v2962_v41, %v1223_v13 }
 0x766   : > { %v2737_v16 = vpop.eup %2736 }
 0x767   : > { %2509 = vmatpush3.bf16.msra.mxu0 %v874_v15  ;;  %v866_v17 = vmul.f32 %v2737_v16, %v2731_v4 }
 0x768   : > { %v1084_v18 = vpop.xlane.xlu1 %1083  ;;  %2520 = vmatprep.subr.bf16.mxu0 %v2778_v33 }
 0x769   : > { %2740 = vrcp.f32 %v1084_v18  ;;  %v867_v19 = vpack.c.bf16 %v866_v17, %v866_v17 }
 0x76b   : > { %2511 = vmatmul.mubr.msk.bf16.vlgmr.msra.gmra.mxu0 %vm754_vm7, %v867_v19 }
 0x76c   : > { %2521 = vmatpush3.bf16.msra.mxu0 %v984_v20  ;;  %2522 = vmatprep.mubr.msk.bf16.mxu0 %vm2779_vm1, %v2778_v33  ;;  %v1089_v21 = vpop.permute.xlu1 %1088 }
 0x76d   : > { %2532 = vmatprep.subr.bf16.mxu0 %v2778_v33  ;;  %v1094_v25 = vand.u32 %v1089_v21, %v2985_v62  ;;  %v2709_v21 = vld [vmem:[%s3333_s5 + $0x10] sm:$0xff]  }
 0x76e   : > { %v2739_v54 = vpop.eup %2738 }
 0x76f   : > { %v976_v22 = vmul.f32 %v2739_v54, %v2733_v7  ;;  %v2708_v54 = vld [vmem:[%s3333_s5 + $0x18] sm:$0xff]  }
 0x770   : > { %v1161_v35 = vpop.permute.xlu1 %1160 }
 0x771   : > { %v977_v23 = vpack.c.bf16 %v976_v22, %v976_v22  ;;  %2539 = vmatpush3.bf16.msra.mxu1 %v1161_v35  ;;  %v2711_v22 = vld [vmem:[%s3333_s5] sm:$0xff]  }
 0x772   : > { %2540 = vmatprep.subr.bf16.mxu1 %v2778_v33 }
 0x773   : > { %2523 = vmatmul.mubr.msk.bf16.vlgmr.msra.gmra.mxu0 %vm754_vm7, %v977_v23  ;;  %v2342_v23 = vld [vmem:[%s3337_s9] ss:$0 sm:$0xff] }
 0x774   : > { %2533 = vmatpush3.bf16.msra.mxu0 %v1094_v25  ;;  %2534 = vmatprep.mubr.msk.bf16.mxu0 %vm2779_vm1, %v2778_v33 }
 0x775   : > { %2546 = vmatprep.subr.bf16.mxu0 %v2778_v33 }
 0x776   : > { %v2741_v26 = vpop.eup %2740 }
 0x777   : > { %v1086_v27 = vmul.f32 %v2741_v26, %v2735_v9 }
 0x779   : > { %v1087_v30 = vpack.c.bf16 %v1086_v27, %v1086_v27 }
 0x77b   : > { %2535 = vmatmul.mubr.msk.bf16.vlgmr.msra.gmra.mxu0 %vm754_vm7, %v1087_v30 }
 0x77c   : > { %2547 = vmatpush3.bf16.msra.mxu0 %v2704_v29  ;;  %2550 = vmatprep.mubr.msk.bf16.mxu0 %vm2779_vm1, %v2778_v33 }
 0x77d   : > { %2548 = vmatprep.subr.bf16.mxu0 %v2778_v33 }
 0x780   : > { %2549 = vmatpush3.bf16.msra.mxu0 %v2707_v31 }
 0x781   : > { %2566 = vmatprep.subr.bf16.mxu0 %v2778_v33 }
 0x82b   : > { %v910_v36 = vpop.f32.mrf.mxu0 }
 0x82c   : > { %1137 = vrot.lane.b32.xlu0 %v910_v36, %s3344_s18 }
 0x82d   : > { %v2512_v37 = vpop.f32.mrf.mxu0 }
 0x82f   : > { %v913_v38 = vpop.f32.mrf.mxu0 }
 0x831   : > { %v2513_v43 = vpop.f32.mrf.mxu0 }
 0x833   : > { %v1020_v44 = vpop.f32.mrf.mxu0 }
 0x834   : > { %1141 = vrot.lane.b32.xlu1 %v1020_v44, %s3343_s20  ;;  %s3357_s20 = sshll.u32 %s3359_s22, 3 }
 0x835   : > { %v2524_v45 = vpop.f32.mrf.mxu0 }
 0x837   : > { %v1023_v46 = vpop.f32.mrf.mxu0 }
 0x838   : > { %1158 = vrot.lane.b32.xlu1 %v2946_v34, %s3345_s19 }
 0x839   : > { %v2525_v32 = vpop.f32.mrf.mxu0 }
 0x83b   : > { %v1130_v47 = vpop.f32.mrf.mxu0 }
 0x83c   : > { %1145 = vrot.lane.b32.xlu0 %v1130_v47, %s3342_s25  ;;  %v1311_v47 = vrot.slane %v3086_v59, %v2965_v42  ;;  %v3137_v59 = vld [vmem:[%s3332_s4 + $0x30] ss:$8 sps:$4 sm:$0xff]  }
 0x83d   : > { %v2536_v48 = vpop.f32.mrf.mxu0 }
 0x83f   : > { %v1133_v49 = vpop.f32.mrf.mxu0 }
 0x841   : > { %v2537_v50 = vpop.f32.mrf.mxu0 }
 0x89e   : > { %v1138_v52 = vpop.permute.xlu0 %1137 }
 0x89f   : > { %v1148_v55 = vsel %vm692_vm3, %v3027_v28, %v1138_v52 }
 0x8a6   : > { %v1142_v51 = vpop.permute.xlu1 %1141 }
 0x8a7   : > { %v1150_v34 = vsel %vm1149_vm8, %v1148_v55, %v1142_v51 }
 0x8aa   : > { %v1159_v53 = vpop.permute.xlu1 %1158 }
 0x8ab   : > { %2541 = vmatpush3.bf16.msra.mxu1 %v1159_v53 }
 0x8ac   : > { %2554 = vmatprep.subr.bf16.mxu1 %v2778_v33 }
 0x8ae   : > { %v1146_v56 = vpop.permute.xlu0 %1145 }
 0x8af   : > { %v1152_v57 = vsel %vm1151_vm9, %v1150_v34, %v1146_v56 }
 0x8b0   : > { %v1153_v58 = vpack.c.bf16 %v1152_v57, %v1152_v57 }
 0x8b2   : > { %2543 = vmatmul.mubr.msk.bf16.vlgmr.msra.gmra.mxu1 %vm642_vm2, %v1153_v58 }
 0x8b3   : > { %2562 = vmatprep.mubr.msk.bf16.mxu1 %vm2779_vm1, %v2778_v33  ;;  %2555 = vmatpush3.bf16.msra.mxu1 %v2708_v54 }
 0x8b4   : > { %2556 = vmatprep.subr.bf16.mxu1 %v2778_v33 }
 0x8b7   : > { %2557 = vmatpush3.bf16.msra.mxu1 %v2709_v21 }
 0x8b8   : > { %2558 = vmatprep.subr.bf16.mxu1 %v2778_v33 }
 0x972   : > { %v1201_v28 = vpop.f32.mrf.mxu1 }
 0x973   : > { %v1202_v61 = vadd.f32 %v1201_v28, %v1157_v60  ;;  %v3143_v28 = vld [vmem:[%s3332_s4 + $0x20] ss:$8 sps:$4 sm:$0xff]  }
 0x974   : > { %v2544_v63 = vpop.f32.mrf.mxu1 }
 0x975   : > { %v1207_v0 = vadd.f32 %v1202_v61, %v2928_v24  ;;  %v1228_v24 = vsub.s32 3, %v2954_v39  ;;  %v2720_v39 = vld [vmem:[%s3333_s5 + $0x28] sm:$0xff]  }
 0x976   : > { %v1204_v1 = vpop.f32.mrf.mxu1 }
 0x977   : > { %v1208_v3 = vsel %vm597_vm0, %v1207_v0, 0.0  ;;  %v1229_v17 = vrot.slane %v2962_v41, %v1228_v24  ;;  %v2710_v41 = vld [vmem:[%s3333_s5 + $0x8] sm:$0xff]   ;;  %v3151_v1 = vld [vmem:[%s3334_s6 + $0x4] sm:$0xf] }
 0x978   : > { %1209 = vadd.xlane.f32.xlu0 %v1208_v3  ;;  %v2545_v4 = vpop.f32.mrf.mxu1  ;;  %2559 = vmatpush3.bf16.msra.mxu1 %v2710_v41  ;;  %v1406_v3 = vrot.slane %v3151_v1, %v2957_v40 }
 0x979   : > { %2560 = vmatprep.subr.bf16.mxu1 %v2778_v33 }
 0x97c   : > { %2561 = vmatpush3.bf16.msra.mxu1 %v2711_v22 }
 0x97d   : > { %2580 = vmatprep.subr.bf16.mxu1 %v2778_v33 }
 0xa01   : > { %v1210_v5 = vpop.xlane.xlu0 %1209 }
 0xa02   : > { %v1211_v6 = vmul.f32 0.03125, %v1210_v5 }
 0xa04   : > { %v1212_v7 = vsub.f32 %v1207_v0, %v1211_v6  ;;  %v1411_v6 = vrot.slane %v3151_v1, %v2965_v42 }
 0xa06   : > { %v1213_v8 = vmul.f32 %v1212_v7, %v1212_v7 }
 0xa08   : > { %v1214_v9 = vsel %vm597_vm0, %v1213_v8, 0.0 }
 0xa09   : > { %1215 = vadd.xlane.f32.xlu1 %v1214_v9 }
 0xa92   : > { %v1216_v10 = vpop.xlane.xlu1 %1215 }
 0xa93   : > { %v1217_v11 = vmul.f32 0.03125, %v1216_v10  ;;  %v2358_v10 = vld [vmem:[%s3335_s7 + $0x1] ss:$0 sm:$0xff] }
 0xa95   : > { %v1218_v12 = vadd.f32 1e-05, %v1217_v11 }
 0xa97   : > { %2742 = vrsqrt.f32 %v1218_v12 }
 0xaa4   : > { %v2743_v15 = vpop.eup %2742 }
 0xaa5   : > { %v1220_v16 = vmul.f32 %v2743_v15, %v1212_v7 }
 0xaa7   : > { %v1225_v18 = vmul.f32 %v1224_v14, %v1220_v16 }
 0xaa9   : > { %v1230_v19 = vadd.f32 %v1229_v17, %v1225_v18 }
 0xaab   : > { %v1231_v20 = vpack.c.bf16 %v1230_v19, %v1230_v19 }
 0xaad   : > { %2551 = vmatmul.mubr.msk.bf16.vlgmr.msra.gmra.mxu0 %vm642_vm2, %v1231_v20 }
 0xaae   : > { %2570 = vmatprep.mubr.msk.bf16.mxu0 %vm2779_vm1, %v2778_v33  ;;  %2567 = vmatpush3.bf16.msra.mxu0 %v3137_v59 }
 0xaaf   : > { %2568 = vmatprep.subr.bf16.mxu0 %v2778_v33 }
 0xab2   : > { %2569 = vmatpush3.bf16.msra.mxu0 %v3143_v28 }
 0xab3   : > { %2574 = vmatprep.subr.bf16.mxu0 %v2778_v33 }
 0xb6d   : > { %v1284_v25 = vpop.f32.mrf.mxu0 }
 0xb6e   : > { %v1285_v26 = vadd.f32 %v2342_v23, %v1284_v25 }
 0xb6f   : > { %v2552_v27 = vpop.f32.mrf.mxu0 }
 0xb70   : > { %v1291_v29 = vmul.f32 0.044715, %v1285_v26  ;;  %v1290_v44 = vmul.f32 0.5, %v1285_v26 }
 0xb71   : > { %v1287_v30 = vpop.f32.mrf.mxu0 }
 0xb72   : > { %v1292_v31 = vmul.f32 %v1291_v29, %v1285_v26 }
 0xb73   : > { %v2553_v35 = vpop.f32.mrf.mxu0 }
 0xb74   : > { %v1293_v36 = vmul.f32 %v1292_v31, %v1285_v26 }
 0xb76   : > { %v1294_v37 = vadd.f32 %v1293_v36, %v1285_v26 }
 0xb78   : > { %v1295_v38 = vmul.f32 0.7978846, %v1294_v37 }
 0xb7a   : > { %2744 = vtanh.f32 %v1295_v38 }
 0xb87   : > { %v2745_v43 = vpop.eup %2744 }
 0xb88   : > { %v1297_v45 = vadd.f32 1.0, %v2745_v43 }
 0xb8a   : > { %v1298_v46 = vmul.f32 %v1297_v45, %v1290_v44 }
 0xb8c   : > { %v1299_v32 = vpack.c.bf16 %v1298_v46, %v1298_v46 }
 0xb8e   : > { %2563 = vmatmul.mubr.msk.bf16.vlgmr.msra.gmra.mxu1 %vm1336_vm10, %v1299_v32 }
 0xb8f   : > { %2582 = vmatprep.mubr.msk.bf16.mxu1 %vm2779_vm1, %v2778_v33 }
 0xc4e   : > { %v1374_v48 = vpop.f32.mrf.mxu1 }
 0xc4f   : > { %v1375_v49 = vadd.f32 %v1374_v48, %v1311_v47 }
 0xc50   : > { %v2564_v50 = vpop.f32.mrf.mxu1 }
 0xc51   : > { %v3128_v51 = vadd.f32 %v1375_v49, %v1207_v0 }
 0xc52   : > { %v1377_v52 = vpop.f32.mrf.mxu1 }
 0xc53   : > { %v1390_v53 = vsel %vm597_vm0, %v3128_v51, 0.0 }
 0xc54   : > { %1391 = vadd.xlane.f32.xlu0 %v1390_v53  ;;  %v2565_v55 = vpop.f32.mrf.mxu1 }
 0xcdd   : > { %v1392_v34 = vpop.xlane.xlu0 %1391 }
 0xcde   : > { %v1393_v56 = vmul.f32 0.03125, %v1392_v34 }
 0xce0   : > { %v1394_v57 = vsub.f32 %v3128_v51, %v1393_v56 }
 0xce2   : > { %v1395_v58 = vmul.f32 %v1394_v57, %v1394_v57 }
 0xce4   : > { %v1396_v60 = vsel %vm597_vm0, %v1395_v58, 0.0 }
 0xce5   : > { %1397 = vadd.xlane.f32.xlu0 %v1396_v60 }
 0xd6e   : > { %v1398_v61 = vpop.xlane.xlu0 %1397 }
 0xd6f   : > { %v1399_v63 = vmul.f32 0.03125, %v1398_v61 }
 0xd71   : > { %v1400_v0 = vadd.f32 1e-05, %v1399_v63 }
 0xd73   : > { %2746 = vrsqrt.f32 %v1400_v0 }
 0xd80   : > { %v2747_v4 = vpop.eup %2746 }
 0xd81   : > { %v1402_v5 = vmul.f32 %v2747_v4, %v1394_v57 }
 0xd83   : > { %v1407_v7 = vmul.f32 %v1406_v3, %v1402_v5 }
 0xd85   : > { %v1412_v8 = vadd.f32 %v1411_v6, %v1407_v7 }
 0xd87   : > { %v1413_v9 = vpack.c.bf16 %v1412_v8, %v1412_v8 }
 0xd89   : > { %2571 = vmatmul.mubr.msk.bf16.vlgmr.msra.gmra.mxu0 %vm642_vm2, %v1413_v9 }
 0xd8a   : > { %2576 = vmatprep.mubr.msk.bf16.mxu0 %vm2779_vm1, %v2778_v33 }
 0xe49   : > { %v1471_v11 = vpop.f32.mrf.mxu0 }
 0xe4a   : > { %v1472_v12 = vadd.f32 %v2358_v10, %v1471_v11 }
 0xe4b   : > { %v2572_v14 = vpop.f32.mrf.mxu0 }
 0xe4c   : > { %v1477_v15 = vmul.f32 0.35355338, %v1472_v12  ;;  %v3163_v16 = vpack.c.bf16 %v1472_v12, %v1472_v12 }
 0xe4d   : > { %v1474_v17 = vpop.f32.mrf.mxu0 }
 0xe4e   : > { %1592 = vrot.lane.b32.xlu1 %v3163_v16, %s2784_s28  ;;  %1481 = vrot.lane.b32.xlu0 %v3163_v16, %s2781_s24  ;;  %v1478_v19 = vpack.c.bf16 %v1477_v15, %v1477_v15  ;;  %s3350_s24 = smov 56   ;;  %s3352_s28 = smov 40  }
 0xe4f   : > { %v2573_v18 = vpop.f32.mrf.mxu0 }
 0xe52   : > { %1700 = vrot.lane.b32.xlu0 %v1478_v19, %s2786_s30  ;;  %1590 = vrot.lane.b32.xlu1 %v1478_v19, %s2785_s29  ;;  %s3354_s29 = smov 8   ;;  %s3355_s30 = smov 16  }
 0xe56   : > { %1810 = vrot.lane.b32.xlu0 %v1478_v19, %s2788_s14  ;;  %1702 = vrot.lane.b32.xlu1 %v3163_v16, %s2783_s27  ;;  %s3351_s27 = smov 48  }
 0xe5a   : > { %1812 = vrot.lane.b32.xlu1 %v3163_v16, %s2787_s13  ;;  %s3356_s13 = smov 24  }
 0xec0   : > { %v1482_v20 = vpop.permute.xlu0 %1481  ;;  %v1593_v21 = vpop.permute.xlu1 %1592 }
 0xec1   : > { %v1487_v54 = vsel %vm692_vm3, %v1482_v20, 0  ;;  %v1598_v22 = vsel %vm692_vm3, %v1593_v21, 0 }
 0xec2   : > { %2575 = vmatpush3.bf16.xpose.msra.mxu0 %v1487_v54 }
 0xec3   : > { %2586 = vmatprep.subr.bf16.mxu0 %v2778_v33 }
 0xec4   : > { %v1591_v41 = vpop.permute.xlu1 %1590  ;;  %v1701_v27 = vpop.permute.xlu0 %1700 }
 0xec8   : > { %v1703_v23 = vpop.permute.xlu1 %1702  ;;  %v1811_v30 = vpop.permute.xlu0 %1810 }
 0xec9   : > { %2577 = vmatmul.mubr.msk.bf16.vlgmr.msra.gmra.mxu0 %vm692_vm3, %v1478_v19  ;;  %v1708_v25 = vsel %vm692_vm3, %v1703_v23, 0 }
 0xeca   : > { %2587 = vmatpush3.bf16.xpose.msra.mxu0 %v1598_v22  ;;  %2588 = vmatprep.mubr.msk.bf16.mxu0 %vm2779_vm1, %v2778_v33 }
 0xecb   : > { %2598 = vmatprep.subr.bf16.mxu0 %v2778_v33 }
 0xecc   : > { %v1813_v26 = vpop.permute.xlu1 %1812 }
 0xecd   : > { %v1818_v29 = vsel %vm692_vm3, %v1813_v26, 0 }
 0xed1   : > { %2589 = vmatmul.mubr.msk.bf16.vlgmr.msra.gmra.mxu0 %vm692_vm3, %v1591_v41 }
 0xed2   : > { %2599 = vmatpush3.bf16.xpose.msra.mxu0 %v1708_v25  ;;  %2600 = vmatprep.mubr.msk.bf16.mxu0 %vm2779_vm1, %v2778_v33 }
 0xed3   : > { %2610 = vmatprep.subr.bf16.mxu0 %v2778_v33 }
 0xed9   : > { %2601 = vmatmul.mubr.msk.bf16.vlgmr.msra.gmra.mxu0 %vm692_vm3, %v1701_v27 }
 0xeda   : > { %2611 = vmatpush3.bf16.xpose.msra.mxu0 %v1818_v29  ;;  %2612 = vmatprep.mubr.msk.bf16.mxu0 %vm2779_vm1, %v2778_v33 }
 0xedb   : > { %2622 = vmatprep.subr.bf16.mxu0 %v2778_v33 }
 0xee1   : > { %2613 = vmatmul.mubr.msk.bf16.vlgmr.msra.gmra.mxu0 %vm692_vm3, %v1811_v30 }
 0xee2   : > { %2626 = vmatprep.mubr.msk.bf16.mxu0 %vm2779_vm1, %v2778_v33 }
 0xf89   : > { %v1523_v31 = vpop.f32.mrf.mxu0 }
 0xf8a   : > { %v1524_v35 = vadd.f32 %v1523_v31, %v2995_v2 }
 0xf8b   : > { %v2578_v36 = vpop.f32.mrf.mxu0 }
 0xf8c   : > { %v1529_v37 = vsel %vm739_vm6, %v1524_v35, -inf }
 0xf8d   : > { %1530 = vmax.xlane.f32.xlu1 %v1529_v37  ;;  %v1526_v38 = vpop.f32.mrf.mxu0 }
 0xf8f   : > { %v2579_v43 = vpop.f32.mrf.mxu0 }
 0xf91   : > { %v1634_v44 = vpop.f32.mrf.mxu0 }
 0xf92   : > { %v1635_v45 = vadd.f32 %v1634_v44, %v2995_v2 }
 0xf93   : > { %v2590_v46 = vpop.f32.mrf.mxu0 }
 0xf94   : > { %v1640_v32 = vsel %vm739_vm6, %v1635_v45, -inf }
 0xf95   : > { %1641 = vmax.xlane.f32.xlu0 %v1640_v32  ;;  %v1637_v47 = vpop.f32.mrf.mxu0 }
 0xf97   : > { %v2591_v48 = vpop.f32.mrf.mxu0 }
 0xf99   : > { %v1744_v49 = vpop.f32.mrf.mxu0 }
 0xf9a   : > { %v1745_v50 = vadd.f32 %v1744_v49, %v2995_v2 }
 0xf9b   : > { %v2602_v52 = vpop.f32.mrf.mxu0 }
 0xf9c   : > { %v1750_v53 = vsel %vm739_vm6, %v1745_v50, -inf }
 0xf9d   : > { %1751 = vmax.xlane.f32.xlu0 %v1750_v53  ;;  %v1747_v55 = vpop.f32.mrf.mxu0 }
 0xf9f   : > { %v2603_v34 = vpop.f32.mrf.mxu0 }
 0xfa1   : > { %v1854_v56 = vpop.f32.mrf.mxu0 }
 0xfa2   : > { %v1855_v57 = vadd.f32 %v1854_v56, %v2995_v2 }
 0xfa3   : > { %v2614_v58 = vpop.f32.mrf.mxu0 }
 0xfa4   : > { %v1860_v60 = vsel %vm739_vm6, %v1855_v57, -inf }
 0xfa5   : > { %1861 = vmax.xlane.f32.xlu0 %v1860_v60  ;;  %v1857_v61 = vpop.f32.mrf.mxu0 }
 0xfa7   : > { %v2615_v63 = vpop.f32.mrf.mxu0 }
0x1016   : > { %v1531_v0 = vpop.xlane.xlu1 %1530 }
0x1017   : > { %v1532_v3 = vsub.f32 %v1524_v35, %v1531_v0 }
0x1019   : > { %v1533_v4 = vmul.f32 1.442695, %v1532_v3 }
0x101b   : > { %2748 = vpow2.f32 %v1533_v4 }
0x101e   : > { %v1642_v5 = vpop.xlane.xlu0 %1641 }
0x101f   : > { %v1643_v6 = vsub.f32 %v1635_v45, %v1642_v5 }
0x1021   : > { %v1644_v7 = vmul.f32 1.442695, %v1643_v6 }
0x1023   : > { %2750 = vpow2.f32 %v1644_v7 }
0x1026   : > { %v1752_v10 = vpop.xlane.xlu0 %1751 }
0x1027   : > { %v1753_v19 = vsub.f32 %v1745_v50, %v1752_v10 }
0x1028   : > { %v2749_v8 = vpop.eup %2748 }
0x1029   : > { %v1535_v9 = vsel %vm739_vm6, %v2749_v8, 0.0  ;;  %v1754_v20 = vmul.f32 1.442695, %v1753_v19 }
0x102a   : > { %1536 = vadd.xlane.f32.xlu1 %v1535_v9 }
0x102e   : > { %v1862_v2 = vpop.xlane.xlu0 %1861 }
0x102f   : > { %v1863_v11 = vsub.f32 %v1855_v57, %v1862_v2 }
0x1030   : > { %v2751_v12 = vpop.eup %2750 }
0x1031   : > { %v1864_v14 = vmul.f32 1.442695, %v1863_v11  ;;  %v1646_v15 = vsel %vm739_vm6, %v2751_v12, 0.0 }
0x1032   : > { %1647 = vadd.xlane.f32.xlu0 %v1646_v15  ;;  %v3254_v15 = vld [vmem:[%s3336_s8 + $0x2] sm:$0x3] }
0x1033   : > { %2752 = vpow2.f32 %v1864_v14 }
0x1034   : > { %2754 = vpow2.f32 %v1754_v20 }
0x103b   : > { %1541 = vrot.lane.b32.xlu1 %v3163_v16, %s2780_s23  ;;  %s3353_s23 = smov 32  }
0x1040   : > { %v2753_v17 = vpop.eup %2752 }
0x1041   : > { %v1866_v18 = vsel %vm739_vm6, %v2753_v17, 0.0  ;;  %v2755_v54 = vpop.eup %2754 }
0x1042   : > { %1867 = vadd.xlane.f32.xlu0 %v1866_v18  ;;  %v1756_v21 = vsel %vm739_vm6, %v2755_v54, 0.0 }
0x1058   : > { %1652 = vrot.lane.b32.xlu0 %v3163_v16, %s3350_s24 }
0x105f   : > { %1757 = vadd.xlane.f32.xlu1 %v1756_v21 }
0x1070   : > { %1762 = vrot.lane.b32.xlu1 %v3163_v16, %s3351_s27 }
0x1074   : > { %1872 = vrot.lane.b32.xlu1 %v3163_v16, %s3352_s28  ;;  %s411_s28 = scalar_lea.vmem %s3340_s12, %s3357_s20 }
0x1078   : > { %1942 = vrot.lane.b32.xlu1 %v3137_v59, %s3353_s23 }
0x10b3   : > { %v1537_v41 = vpop.xlane.xlu1 %1536 }
0x10b4   : > { %2756 = vrcp.f32 %v1537_v41 }
0x10b7   : > { %v1542_v22 = vpop.permute.xlu1 %1541 }
0x10b8   : > { %v1547_v23 = vand.u32 %v1542_v22, %v2985_v62 }
0x10ba   : > { %2581 = vmatpush3.bf16.msra.mxu1 %v1547_v23 }
0x10bb   : > { %2592 = vmatprep.subr.bf16.mxu1 %v2778_v33  ;;  %v1648_v25 = vpop.xlane.xlu0 %1647 }
0x10bc   : > { %2758 = vrcp.f32 %v1648_v25 }
0x10c1   : > { %v2757_v26 = vpop.eup %2756 }
0x10c2   : > { %v1539_v27 = vmul.f32 %v2757_v26, %v2749_v8 }
0x10c4   : > { %v1540_v29 = vpack.c.bf16 %v1539_v27, %v1539_v27 }
0x10c6   : > { %2583 = vmatmul.mubr.msk.bf16.vlgmr.msra.gmra.mxu1 %vm754_vm7, %v1540_v29 }
0x10c7   : > { %2594 = vmatprep.mubr.msk.bf16.mxu1 %vm2779_vm1, %v2778_v33 }
0x10c9   : > { %v2759_v59 = vpop.eup %2758 }
0x10ca   : > { %v1650_v31 = vmul.f32 %v2759_v59, %v2751_v12 }
0x10cb   : > { %v1868_v16 = vpop.xlane.xlu0 %1867 }
0x10cc   : > { %v1651_v36 = vpack.c.bf16 %v1650_v31, %v1650_v31  ;;  %v2006_v31 = vrot.slane %v3151_v1, %v1223_v13  ;;  %v2719_v13 = vld [vmem:[%s3333_s5 + $0x30] sm:$0xff]  }
0x10cf   : > { %v1653_v30 = vpop.permute.xlu0 %1652 }
0x10d0   : > { %v1658_v35 = vand.u32 %v1653_v30, %v2985_v62 }
0x10d2   : > { %2593 = vmatpush3.bf16.msra.mxu1 %v1658_v35 }
0x10d3   : > { %2604 = vmatprep.subr.bf16.mxu1 %v2778_v33 }
0x10d5   : > { %2595 = vmatmul.mubr.msk.bf16.vlgmr.msra.gmra.mxu1 %vm754_vm7, %v1651_v36 }
0x10d6   : > { %2606 = vmatprep.mubr.msk.bf16.mxu1 %vm2779_vm1, %v2778_v33 }
0x10e8   : > { %v1758_v37 = vpop.xlane.xlu1 %1757 }
0x10e9   : > { %2760 = vrcp.f32 %v1758_v37  ;;  %v2011_v37 = vrot.slane %v3151_v1, %v1228_v24  ;;  %v2721_v24 = vld [vmem:[%s3333_s5 + $0x20] sm:$0xff]  }
0x10ea   : > { %2762 = vrcp.f32 %v1868_v16  ;;  %v2372_v1 = vld [vmem:[%s3337_s9 + $0x1] ss:$0 sm:$0xff] }
0x10ec   : > { %v1763_v38 = vpop.permute.xlu1 %1762 }
0x10ed   : > { %v1768_v43 = vand.u32 %v1763_v38, %v2985_v62 }
0x10ef   : > { %2605 = vmatpush3.bf16.msra.mxu1 %v1768_v43 }
0x10f0   : > { %2616 = vmatprep.subr.bf16.mxu1 %v2778_v33  ;;  %v1873_v45 = vpop.permute.xlu1 %1872 }
0x10f1   : > { %v1878_v48 = vand.u32 %v1873_v45, %v2985_v62  ;;  %v2718_v45 = vld [vmem:[%s3333_s5 + $0x38] sm:$0xff]  }
0x10f4   : > { %v1943_v55 = vpop.permute.xlu1 %1942 }
0x10f5   : > { %2623 = vmatpush3.bf16.msra.mxu0 %v1943_v55 }
0x10f6   : > { %v2761_v44 = vpop.eup %2760  ;;  %2624 = vmatprep.subr.bf16.mxu0 %v2778_v33 }
0x10f7   : > { %v1760_v46 = vmul.f32 %v2761_v44, %v2755_v54  ;;  %v2763_v47 = vpop.eup %2762 }
0x10f8   : > { %v1870_v49 = vmul.f32 %v2763_v47, %v2753_v17  ;;  %v1939_v17 = vrot.slane %v3254_v15, %v2957_v40  ;;  %v2716_v40 = vld [vmem:[%s3332_s4 + $0x34] ss:$8 sps:$4 sm:$0xff]  }
0x10f9   : > { %v1761_v32 = vpack.c.bf16 %v1760_v46, %v1760_v46 }
0x10fa   : > { %v1871_v50 = vpack.c.bf16 %v1870_v49, %v1870_v49 }
0x10fb   : > { %2607 = vmatmul.mubr.msk.bf16.vlgmr.msra.gmra.mxu1 %vm754_vm7, %v1761_v32 }
0x10fc   : > { %2617 = vmatpush3.bf16.msra.mxu1 %v1878_v48  ;;  %2618 = vmatprep.mubr.msk.bf16.mxu1 %vm2779_vm1, %v2778_v33 }
0x10fd   : > { %2630 = vmatprep.subr.bf16.mxu1 %v2778_v33 }
0x1103   : > { %2619 = vmatmul.mubr.msk.bf16.vlgmr.msra.gmra.mxu1 %vm754_vm7, %v1871_v50 }
0x1104   : > { %2634 = vmatprep.mubr.msk.bf16.mxu1 %vm2779_vm1, %v2778_v33  ;;  %2631 = vmatpush3.bf16.msra.mxu1 %v2716_v40 }
0x1105   : > { %2632 = vmatprep.subr.bf16.mxu1 %v2778_v33 }
0x1186   : > { %v1583_v52 = vpop.f32.mrf.mxu1 }
0x1188   : > { %v2584_v53 = vpop.f32.mrf.mxu1 }
0x118a   : > { %v1586_v34 = vpop.f32.mrf.mxu1 }
0x118c   : > { %v2585_v62 = vpop.f32.mrf.mxu1 }
0x1195   : > { %v1694_v56 = vpop.f32.mrf.mxu1 }
0x1196   : > { %1921 = vrot.lane.b32.xlu0 %v1694_v56, %s3354_s29 }
0x1197   : > { %v2596_v57 = vpop.f32.mrf.mxu1 }
0x1199   : > { %v1697_v58 = vpop.f32.mrf.mxu1 }
0x119b   : > { %v2597_v60 = vpop.f32.mrf.mxu1 }
0x11bb   : > { %v1804_v61 = vpop.f32.mrf.mxu1 }
0x11bc   : > { %1925 = vrot.lane.b32.xlu1 %v1804_v61, %s3355_s30  ;;  %v2095_v61 = vrot.slane %v3254_v15, %v2965_v42  ;;  %v2722_v42 = vld [vmem:[%s3339_s11 + $0x8] sm:$0xff]  }
0x11bd   : > { %v2608_v63 = vpop.f32.mrf.mxu1 }
0x11bf   : > { %v1807_v0 = vpop.f32.mrf.mxu1 }
0x11c0   : > { %1940 = vrot.lane.b32.xlu1 %v3143_v28, %s3353_s23 }
0x11c1   : > { %v2609_v3 = vpop.f32.mrf.mxu1 }
0x11c3   : > { %v1914_v4 = vpop.f32.mrf.mxu1 }
0x11c4   : > { %1929 = vrot.lane.b32.xlu0 %v1914_v4, %s3356_s13 }
0x11c5   : > { %v2620_v5 = vpop.f32.mrf.mxu1 }
0x11c7   : > { %v1917_v6 = vpop.f32.mrf.mxu1 }
0x11c9   : > { %v2621_v7 = vpop.f32.mrf.mxu1 }
0x1208   : > { %v1922_v9 = vpop.permute.xlu0 %1921 }
0x1209   : > { %v1932_v2 = vsel %vm692_vm3, %v1583_v52, %v1922_v9 }
0x122e   : > { %v1926_v8 = vpop.permute.xlu1 %1925 }
0x122f   : > { %v1933_v11 = vsel %vm1149_vm8, %v1932_v2, %v1926_v8 }
0x1232   : > { %v1941_v10 = vpop.permute.xlu1 %1940 }
0x1233   : > { %2625 = vmatpush3.bf16.msra.mxu0 %v1941_v10 }
0x1234   : > { %2638 = vmatprep.subr.bf16.mxu0 %v2778_v33 }
0x1236   : > { %v1930_v12 = vpop.permute.xlu0 %1929 }
0x1237   : > { %v1934_v28 = vsel %vm1151_vm9, %v1933_v11, %v1930_v12  ;;  %v2723_v12 = vld [vmem:[%s3339_s11] sm:$0xff]  }
0x1238   : > { %v1935_v14 = vpack.c.bf16 %v1934_v28, %v1934_v28 }
0x123a   : > { %2627 = vmatmul.mubr.msk.bf16.vlgmr.msra.gmra.mxu0 %vm642_vm2, %v1935_v14 }
0x123b   : > { %2646 = vmatprep.mubr.msk.bf16.mxu0 %vm2779_vm1, %v2778_v33  ;;  %2639 = vmatpush3.bf16.msra.mxu0 %v2718_v45 }
0x123c   : > { %2640 = vmatprep.subr.bf16.mxu0 %v2778_v33 }
0x123f   : > { %2641 = vmatpush3.bf16.msra.mxu0 %v2719_v13 }
0x1240   : > { %2642 = vmatprep.subr.bf16.mxu0 %v2778_v33 }
0x1243   : > { %2643 = vmatpush3.bf16.msra.mxu0 %v2720_v39 }
0x1244   : > { %2644 = vmatprep.subr.bf16.mxu0 %v2778_v33 }
0x1247   : > { %2645 = vmatpush3.bf16.msra.mxu0 %v2721_v24 }
0x12fa   : > { %v1983_v18 = vpop.f32.mrf.mxu0 }
0x12fb   : > { %v1984_v19 = vadd.f32 %v1983_v18, %v1939_v17  ;;  %v2389_v18 = vld [vmem:[%s3338_s10] ss:$0 sm:$0xff] }
0x12fc   : > { %v2628_v20 = vpop.f32.mrf.mxu0 }
0x12fd   : > { %v3259_v54 = vadd.f32 %v1984_v19, %v3128_v51  ;;  %v2717_v51 = vld [vmem:[%s3332_s4 + $0x24] ss:$8 sps:$4 sm:$0xff]   ;;  %v2390_v20 = vld [vmem:[%s3338_s10 + $0x1] ss:$0 sm:$0xff] }
0x12fe   : > { %v1986_v21 = vpop.f32.mrf.mxu0  ;;  %2633 = vmatpush3.bf16.msra.mxu1 %v2717_v51 }
0x12ff   : > { %v1990_v41 = vsel %vm597_vm0, %v3259_v54, 0.0  ;;  %2650 = vmatprep.subr.bf16.mxu1 %v2778_v33 }
0x1300   : > { %1991 = vadd.xlane.f32.xlu0 %v1990_v41  ;;  %v2629_v22 = vpop.f32.mrf.mxu0 }
0x1389   : > { %v1992_v23 = vpop.xlane.xlu0 %1991 }
0x138a   : > { %v1993_v25 = vmul.f32 0.03125, %v1992_v23 }
0x138c   : > { %v1994_v26 = vsub.f32 %v3259_v54, %v1993_v25 }
0x138e   : > { %v1995_v27 = vmul.f32 %v1994_v26, %v1994_v26 }
0x1390   : > { %v1996_v29 = vsel %vm597_vm0, %v1995_v27, 0.0 }
0x1391   : > { %1997 = vadd.xlane.f32.xlu1 %v1996_v29 }
0x141a   : > { %v1998_v16 = vpop.xlane.xlu1 %1997 }
0x141b   : > { %v1999_v59 = vmul.f32 0.03125, %v1998_v16 }
0x141d   : > { %v2000_v30 = vadd.f32 1e-05, %v1999_v59 }
0x141f   : > { %2764 = vrsqrt.f32 %v2000_v30 }
0x142c   : > { %v2765_v35 = vpop.eup %2764 }
0x142d   : > { %v2002_v36 = vmul.f32 %v2765_v35, %v1994_v26 }
0x142f   : > { %v2007_v38 = vmul.f32 %v2006_v31, %v2002_v36 }
0x1431   : > { %v2012_v43 = vadd.f32 %v2011_v37, %v2007_v38 }
0x1433   : > { %v2013_v44 = vpack.c.bf16 %v2012_v43, %v2012_v43 }
0x1435   : > { %2635 = vmatmul.mubr.msk.bf16.vlgmr.msra.gmra.mxu1 %vm642_vm2, %v2013_v44 }
0x1436   : > { %2654 = vmatprep.mubr.msk.bf16.mxu1 %vm2779_vm1, %v2778_v33  ;;  %2651 = vmatpush3.bf16.msra.mxu1 %v2722_v42 }
0x1437   : > { %2652 = vmatprep.subr.bf16.mxu1 %v2778_v33 }
0x143a   : > { %2653 = vmatpush3.bf16.msra.mxu1 %v2723_v12 }
0x14f5   : > { %v2067_v46 = vpop.f32.mrf.mxu1 }
0x14f6   : > { %v2068_v32 = vadd.f32 %v2372_v1, %v2067_v46 }
0x14f7   : > { %v2636_v47 = vpop.f32.mrf.mxu1 }
0x14f8   : > { %v2074_v48 = vmul.f32 0.044715, %v2068_v32  ;;  %v2073_v56 = vmul.f32 0.5, %v2068_v32 }
0x14f9   : > { %v2070_v49 = vpop.f32.mrf.mxu1 }
0x14fa   : > { %v2075_v50 = vmul.f32 %v2074_v48, %v2068_v32 }
0x14fb   : > { %v2637_v52 = vpop.f32.mrf.mxu1 }
0x14fc   : > { %v2076_v53 = vmul.f32 %v2075_v50, %v2068_v32 }
0x14fe   : > { %v2077_v55 = vadd.f32 %v2076_v53, %v2068_v32 }
0x1500   : > { %v2078_v34 = vmul.f32 0.7978846, %v2077_v55 }
0x1502   : > { %2766 = vtanh.f32 %v2078_v34 }
0x150f   : > { %v2767_v62 = vpop.eup %2766 }
0x1510   : > { %v2080_v57 = vadd.f32 1.0, %v2767_v62 }
0x1512   : > { %v2081_v58 = vmul.f32 %v2080_v57, %v2073_v56 }
0x1514   : > { %v2082_v60 = vpack.c.bf16 %v2081_v58, %v2081_v58 }
0x1516   : > { %2647 = vmatmul.mubr.msk.bf16.vlgmr.msra.gmra.mxu0 %vm1336_vm10, %v2082_v60 }
0x15d6   : > { %v2157_v63 = vpop.f32.mrf.mxu0 }
0x15d7   : > { %v2158_v0 = vadd.f32 %v2157_v63, %v2095_v61 }
0x15d8   : > { %v2648_v3 = vpop.f32.mrf.mxu0 }
0x15d9   : > { %v2163_v4 = vadd.f32 %v2158_v0, %v3259_v54 }
0x15da   : > { %v2160_v5 = vpop.f32.mrf.mxu0 }
0x15db   : > { %v2166_v6 = vsel %vm597_vm0, %v2163_v4, 0.0 }
0x15dc   : > { %2167 = vadd.xlane.f32.xlu0 %v2166_v6  ;;  %v2649_v7 = vpop.f32.mrf.mxu0 }
0x1665   : > { %v2168_v8 = vpop.xlane.xlu0 %2167 }
0x1666   : > { %v2169_v9 = vmul.f32 0.03125, %v2168_v8 }
0x1668   : > { %v2170_v10 = vsub.f32 %v2163_v4, %v2169_v9 }
0x166a   : > { %v2171_v2 = vmul.f32 %v2170_v10, %v2170_v10 }
0x166c   : > { %v2172_v11 = vsel %vm597_vm0, %v2171_v2, 0.0 }
0x166d   : > { %2173 = vadd.xlane.f32.xlu0 %v2172_v11 }
0x16f6   : > { %v2174_v28 = vpop.xlane.xlu0 %2173 }
0x16f7   : > { %v2175_v14 = vmul.f32 0.03125, %v2174_v28 }
0x16f9   : > { %v2176_v15 = vadd.f32 1e-06, %v2175_v14 }
0x16fb   : > { %2768 = vrsqrt.f32 %v2176_v15 }
0x1708   : > { %v2769_v17 = vpop.eup %2768 }
0x1709   : > { %v2178_v19 = vmul.f32 %v2769_v17, %v2170_v10 }
0x170b   : > { %v2183_v54 = vmul.f32 %v2389_v18, %v2178_v19 }
0x170d   : > { %v2188_v21 = vadd.f32 %v2390_v20, %v2183_v54 }
0x170f   : > { %v2189_v41 = vpack.c.bf16 %v2188_v21, %v2188_v21 }
0x1711   : > { %2655 = vmatmul.mubr.msk.bf16.vlgmr.msra.gmra.mxu1 %vm642_vm2, %v2189_v41 }
0x17d1   : > { %v2243_v33 = vpop.f32.mrf.mxu1 }
0x17d2   : > { %2249 = vst [vmem:[%s411_s28] sm:$0x1f] %v2243_v33 }
0x17d3   : > { %v2656_v22 = vpop.f32.mrf.mxu1 }
0x17d5   : > { %v2246_v23 = vpop.f32.mrf.mxu1 }
0x17d7   : > { %v2657_v25 = vpop.f32.mrf.mxu1 }
0x17d8 PF: > { %s22_s21 = sadd.s32 1, %s2776_s21  }
0x17d9   : > { %p19_p4 = scmp.ge.s32.totalorder %s22_s21, 4  }
0x17db   :  { %21 = sbr.rel (!%p19_p4) target bundleno = 1 (0x1), region = 104 }

</bundles_post_ra>
